<compile_context>
chip_gen: v7x
topology: tpu7x:2x2x1
jax: 0.10.0
libtpu: 0.0.40
codegen_flags: <defaults>
</compile_context>

<pallas_src>
import functools
import math

import numpy as np
import jax
import jax.numpy as jnp
from jax.experimental import pallas as pl
from jax.experimental.pallas import tpu as pltpu


# ----------------------------------------------------------------------------
# small helpers
# ----------------------------------------------------------------------------

def _pick_row_tile(M, bytes_per_row, budget=8 * 1024 * 1024):
    """Largest multiple-of-8 row tile that divides M and fits a VMEM budget
    (double-buffered).  Keeps tiles bounded on v7x's smaller VMEM while still
    giving the auto-pipeliner something to overlap."""
    cap = max(8, budget // max(1, 2 * bytes_per_row))
    for tm in (1024, 512, 256, 128, 64, 32, 16, 8):
        if tm <= cap and M % tm == 0:
            return tm
    return M  # fall back to a single full block (allowed: equals full dim)


def _layer_norm_f32(x, g, b, eps):
    mu = jnp.mean(x, axis=-1, keepdims=True)
    var = jnp.mean(jnp.square(x - mu), axis=-1, keepdims=True)
    return (x - mu) * jax.lax.rsqrt(var + eps) * g + b


def _rel_shift_tile(bd, rows, cols, shift_amt, T):
    """Transformer-XL relative shift applied to a resident (T, T) score tile.

    Equivalent to: pad a zero column on the left, view as (T+1, T), drop the
    first row.  Implemented with per-row circular right-rolls (binary
    decomposition -> log2(T) uniform rolls + selects) + one row shift + masks,
    entirely in VMEM (no HBM round trip of the [B,H,T,T] tensor).
    """
    c = bd
    nbits = max(1, (T - 1).bit_length())
    for b in range(nbits):
        amt = 1 << b
        # unambiguous circular right roll by `amt` along lanes
        rolled = jnp.concatenate([c[:, T - amt:], c[:, :T - amt]], axis=1)
        c = jnp.where(((shift_amt >> b) & 1) == 1, rolled, c)
    # result[r, c] = C[r, c]   if c <= r
    #             = 0          if c == r + 1
    #             = C[r+1, c]  if c >= r + 2
    c_up = jnp.concatenate([c[1:, :], c[:1, :]], axis=0)
    return jnp.where(cols <= rows, c,
                     jnp.where(cols == rows + 1, jnp.zeros_like(c), c_up))


# ----------------------------------------------------------------------------
# 1 & 4) fused FFN module:  out = [LN_final](x + 0.5 * W2(swish(W1(LN(x)))))
# ----------------------------------------------------------------------------

def _ffn_block_kernel(x_ref, g_ref, b_ref, w1_ref, b1_ref, w2_ref, b2_ref,
                      fg_ref, fb_ref, o_ref, *, eps, final_eps, final_ln,
                      fc_factor):
    x = x_ref[...]
    xf = x.astype(jnp.float32)
    h = _layer_norm_f32(xf, g_ref[...].astype(jnp.float32),
                        b_ref[...].astype(jnp.float32), eps)
    # feed MXU operands in the input dtype (no f32 up-cast of weights)
    h = jnp.dot(h.astype(x.dtype), w1_ref[...],
                preferred_element_type=jnp.float32)
    h = h + b1_ref[...].astype(jnp.float32)
    h = h * jax.nn.sigmoid(h)                                    # swish
    h = jnp.dot(h.astype(x.dtype), w2_ref[...],
                preferred_element_type=jnp.float32)
    h = h + b2_ref[...].astype(jnp.float32)
    y = fc_factor * h + xf
    if final_ln:
        y = _layer_norm_f32(y, fg_ref[...].astype(jnp.float32),
                            fb_ref[...].astype(jnp.float32), final_eps)
    o_ref[...] = y.astype(o_ref.dtype)


def ffn_block(x2d, ln_g, ln_b, w1, b1, w2, b2, *, eps, fc_factor=0.5,
              final_ln=False, fg=None, fb=None, final_eps=1e-12):
    M, D = x2d.shape
    DFF = w1.shape[1]
    if fg is None:
        fg = jnp.ones((D,), x2d.dtype)
        fb = jnp.zeros((D,), x2d.dtype)
    TM = _pick_row_tile(M, 4 * (2 * D + 2 * DFF))
    return pl.pallas_call(
        functools.partial(_ffn_block_kernel, eps=eps, final_eps=final_eps,
                          final_ln=final_ln, fc_factor=fc_factor),
        out_shape=jax.ShapeDtypeStruct((M, D), x2d.dtype),
        grid=(M // TM,),
        in_specs=[
            pl.BlockSpec((TM, D), lambda i: (i, 0)),
            pl.BlockSpec((1, D), lambda i: (0, 0)),
            pl.BlockSpec((1, D), lambda i: (0, 0)),
            pl.BlockSpec((D, DFF), lambda i: (0, 0)),   # resident weights
            pl.BlockSpec((1, DFF), lambda i: (0, 0)),
            pl.BlockSpec((DFF, D), lambda i: (0, 0)),
            pl.BlockSpec((1, D), lambda i: (0, 0)),
            pl.BlockSpec((1, D), lambda i: (0, 0)),
            pl.BlockSpec((1, D), lambda i: (0, 0)),
        ],
        out_specs=pl.BlockSpec((TM, D), lambda i: (i, 0)),
        compiler_params=pltpu.CompilerParams(dimension_semantics=("parallel",)),
    )(x2d, ln_g.reshape(1, D), ln_b.reshape(1, D), w1, b1.reshape(1, DFF),
      w2, b2.reshape(1, D), fg.reshape(1, D), fb.reshape(1, D))


# ----------------------------------------------------------------------------
# positional-embedding projection (tiny [T,D] x [D,D] matmul)
# ----------------------------------------------------------------------------

def _linear_kernel(x_ref, w_ref, b_ref, o_ref):
    y = jnp.dot(x_ref[...], w_ref[...], preferred_element_type=jnp.float32)
    y = y + b_ref[...].astype(jnp.float32)
    o_ref[...] = y.astype(o_ref.dtype)


def linear(x2d, w, b):
    M, Din = x2d.shape
    Dout = w.shape[1]
    return pl.pallas_call(
        _linear_kernel,
        out_shape=jax.ShapeDtypeStruct((M, Dout), x2d.dtype),
        grid=(1,),
        in_specs=[pl.BlockSpec((M, Din), lambda i: (0, 0)),
                  pl.BlockSpec((Din, Dout), lambda i: (0, 0)),
                  pl.BlockSpec((1, Dout), lambda i: (0, 0))],
        out_specs=pl.BlockSpec((M, Dout), lambda i: (0, 0)),
    )(x2d, w, b.reshape(1, Dout))


# ----------------------------------------------------------------------------
# 2) fused relative multi-head self-attention module (one kernel per batch item)
# ----------------------------------------------------------------------------

def _mha_block_kernel(x_ref, g_ref, b_ref, wqkv_ref, bqkv_ref, pos_ref,
                      wo_ref, bo_ref, o_ref, *, eps, n_heads):
    _, T, D = x_ref.shape
    H = n_heads
    dk = D // H

    x = x_ref[0]                                    # (T, D)
    xf = x.astype(jnp.float32)
    h = _layer_norm_f32(xf, g_ref[...].astype(jnp.float32),
                        b_ref[...].astype(jnp.float32), eps)
    # fused Q/K/V projection; q columns of wqkv are pre-scaled by 1/sqrt(dk)
    qkv = jnp.dot(h.astype(x.dtype), wqkv_ref[...],
                  preferred_element_type=jnp.float32)
    qkv = qkv + bqkv_ref[...].astype(jnp.float32)   # (T, 3D)
    q = qkv[:, :D]
    k = qkv[:, D:2 * D]
    v = qkv[:, 2 * D:]
    pos = pos_ref[...].astype(jnp.float32)          # (T, D) projected positions

    rows = jax.lax.broadcasted_iota(jnp.int32, (T, T), 0)
    cols = jax.lax.broadcasted_iota(jnp.int32, (T, T), 1)
    shift_amt = (rows + 1) % T                      # per-row right-roll amount

    ctx_heads = []
    for hh in range(H):                             # static unroll over heads
        sl = slice(hh * dk, (hh + 1) * dk)
        qh, kh, vh, ph = q[:, sl], k[:, sl], v[:, sl], pos[:, sl]
        ac = jnp.dot(qh, kh.T, preferred_element_type=jnp.float32)
        bd = jnp.dot(qh, ph.T, preferred_element_type=jnp.float32)
        bd = _rel_shift_tile(bd, rows, cols, shift_amt, T)
        e = ac + bd                                 # already scaled via q
        e = e - jnp.max(e, axis=-1, keepdims=True)
        p = jnp.exp(e)
        p = p * pl.reciprocal(jnp.sum(p, axis=-1, keepdims=True), approx=True)
        ctx_heads.append(jnp.dot(p, vh, preferred_element_type=jnp.float32))
    ctx = jnp.concatenate(ctx_heads, axis=1)        # (T, D) lane-dense

    out = jnp.dot(ctx.astype(x.dtype), wo_ref[...],
                  preferred_element_type=jnp.float32)
    out = out + bo_ref[...].astype(jnp.float32) + xf
    o_ref[0] = out.astype(o_ref.dtype)


def mha_block(x_btd, ln_g, ln_b, wqkv, bqkv, pos_p, wo, bo, *, eps, n_heads):
    B, T, D = x_btd.shape
    return pl.pallas_call(
        functools.partial(_mha_block_kernel, eps=eps, n_heads=n_heads),
        out_shape=jax.ShapeDtypeStruct((B, T, D), x_btd.dtype),
        grid=(B,),
        in_specs=[
            pl.BlockSpec((1, T, D), lambda b: (b, 0, 0)),
            pl.BlockSpec((1, D), lambda b: (0, 0)),
            pl.BlockSpec((1, D), lambda b: (0, 0)),
            pl.BlockSpec((D, 3 * D), lambda b: (0, 0)),   # resident weights
            pl.BlockSpec((1, 3 * D), lambda b: (0, 0)),
            pl.BlockSpec((T, D), lambda b: (0, 0)),
            pl.BlockSpec((D, D), lambda b: (0, 0)),
            pl.BlockSpec((1, D), lambda b: (0, 0)),
        ],
        out_specs=pl.BlockSpec((1, T, D), lambda b: (b, 0, 0)),
        compiler_params=pltpu.CompilerParams(dimension_semantics=("parallel",)),
    )(x_btd, ln_g.reshape(1, D), ln_b.reshape(1, D), wqkv,
      bqkv.reshape(1, 3 * D), pos_p, wo, bo.reshape(1, D))


# ----------------------------------------------------------------------------
# 3) fused convolution module (one kernel per batch item)
# ----------------------------------------------------------------------------

def _conv_block_kernel(x_ref, g_ref, b_ref, w1_ref, b1_ref, wdw_ref, bdw_ref,
                       cg_ref, cb_ref, w2_ref, b2_ref, o_ref, *, eps, conv_eps,
                       K):
    _, T, D = x_ref.shape
    x = x_ref[0]                                    # (T, D)
    xf = x.astype(jnp.float32)
    h = _layer_norm_f32(xf, g_ref[...].astype(jnp.float32),
                        b_ref[...].astype(jnp.float32), eps)
    # pointwise conv 1 (matmul) -> GLU
    h = jnp.dot(h.astype(x.dtype), w1_ref[...],
                preferred_element_type=jnp.float32)
    h = h + b1_ref[...].astype(jnp.float32)         # (T, 2D)
    h = h[:, :D] * jax.nn.sigmoid(h[:, D:])         # GLU, (T, D)
    # depthwise conv along time; zero-padding halo built in VMEM (no HBM pad)
    pad = (K - 1) // 2
    hp = jnp.concatenate(
        [jnp.zeros((pad, D), h.dtype), h, jnp.zeros((K - 1 - pad, D), h.dtype)],
        axis=0)
    w_dw = wdw_ref[...].astype(jnp.float32)         # (K, D)
    acc = jnp.zeros((T, D), jnp.float32)
    for kk in range(K):                             # static unroll over taps
        acc = acc + hp[kk:kk + T, :] * w_dw[kk:kk + 1, :]
    h = acc + bdw_ref[...].astype(jnp.float32)
    # conv-module LayerNorm (torch default eps) + swish + pointwise conv 2
    h = _layer_norm_f32(h, cg_ref[...].astype(jnp.float32),
                        cb_ref[...].astype(jnp.float32), conv_eps)
    h = h * jax.nn.sigmoid(h)
    h = jnp.dot(h.astype(x.dtype), w2_ref[...],
                preferred_element_type=jnp.float32)
    h = h + b2_ref[...].astype(jnp.float32)
    o_ref[0] = (h + xf).astype(o_ref.dtype)


def conv_block(x_btd, ln_g, ln_b, pw1_w, pw1_b, dw_w, dw_b, cln_g, cln_b,
               pw2_w, pw2_b, *, eps, conv_eps):
    B, T, D = x_btd.shape
    K = dw_w.shape[0]
    assert K % 2 == 1, "depthwise kernel size must be odd (torch padding=(K-1)//2)"
    return pl.pallas_call(
        functools.partial(_conv_block_kernel, eps=eps, conv_eps=conv_eps, K=K),
        out_shape=jax.ShapeDtypeStruct((B, T, D), x_btd.dtype),
        grid=(B,),
        in_specs=[
            pl.BlockSpec((1, T, D), lambda b: (b, 0, 0)),
            pl.BlockSpec((1, D), lambda b: (0, 0)),
            pl.BlockSpec((1, D), lambda b: (0, 0)),
            pl.BlockSpec((D, 2 * D), lambda b: (0, 0)),
            pl.BlockSpec((1, 2 * D), lambda b: (0, 0)),
            pl.BlockSpec((K, D), lambda b: (0, 0)),
            pl.BlockSpec((1, D), lambda b: (0, 0)),
            pl.BlockSpec((1, D), lambda b: (0, 0)),
            pl.BlockSpec((1, D), lambda b: (0, 0)),
            pl.BlockSpec((D, D), lambda b: (0, 0)),
            pl.BlockSpec((1, D), lambda b: (0, 0)),
        ],
        out_specs=pl.BlockSpec((1, T, D), lambda b: (b, 0, 0)),
        compiler_params=pltpu.CompilerParams(dimension_semantics=("parallel",)),
    )(x_btd, ln_g.reshape(1, D), ln_b.reshape(1, D), pw1_w,
      pw1_b.reshape(1, 2 * D), dw_w, dw_b.reshape(1, D), cln_g.reshape(1, D),
      cln_b.reshape(1, D), pw2_w, pw2_b.reshape(1, D))


# ----------------------------------------------------------------------------
# full block forward
# ----------------------------------------------------------------------------

def conformer_block_forward(xs, pos_embs, p, *, n_heads, layer_norm_eps=1e-12,
                            conv_ln_eps=1e-5):
    B, T, D = xs.shape
    dk = D // n_heads
    M = B * T

    # ---- macaron FFN: x += 0.5 * FFN(LN1(x)) --------------------------------
    xs = ffn_block(xs.reshape(M, D), p["ln1_g"], p["ln1_b"],
                   p["ffn_m_w1"], p["ffn_m_b1"], p["ffn_m_w2"], p["ffn_m_b2"],
                   eps=layer_norm_eps).reshape(B, T, D)

    # ---- relative multi-head self-attention ---------------------------------
    scale = 1.0 / math.sqrt(dk)
    wqkv = jnp.concatenate([p["wq"] * scale, p["wk"], p["wv"]], axis=1)
    bqkv = jnp.concatenate([p["bq"] * scale, p["bk"], p["bv"]], axis=0)
    # non-XL relative PE: positions projected with the value weights (once)
    pos_p = linear(pos_embs.reshape(T, D), p["wv"], p["bv"])
    xs = mha_block(xs, p["ln2_g"], p["ln2_b"], wqkv, bqkv, pos_p,
                   p["wo"], p["bo"], eps=layer_norm_eps, n_heads=n_heads)

    # ---- convolution module --------------------------------------------------
    xs = conv_block(xs, p["ln3_g"], p["ln3_b"], p["pw1_w"], p["pw1_b"],
                    p["dw_w"], p["dw_b"], p["conv_ln_g"], p["conv_ln_b"],
                    p["pw2_w"], p["pw2_b"], eps=layer_norm_eps,
                    conv_eps=conv_ln_eps)

    # ---- final FFN + LN5 (fused) ---------------------------------------------
    xs = ffn_block(xs.reshape(M, D), p["ln4_g"], p["ln4_b"],
                   p["ffn_w1"], p["ffn_b1"], p["ffn_w2"], p["ffn_b2"],
                   eps=layer_norm_eps, final_ln=True, fg=p["ln5_g"],
                   fb=p["ln5_b"], final_eps=layer_norm_eps).reshape(B, T, D)
    return xs


# ----------------------------------------------------------------------------
# pure-JAX reference (same math, unfused) for a correctness check
# ----------------------------------------------------------------------------

def _rel_shift_ref(bd):
    B, H, qlen, klen = bd.shape
    x = jnp.concatenate([jnp.zeros((B, H, qlen, 1), bd.dtype), bd], axis=-1)
    x = x.reshape(B, H, klen + 1, qlen)[:, :, 1:, :]
    return x.reshape(B, H, qlen, klen)


def conformer_block_reference(xs, pos_embs, p, *, n_heads, layer_norm_eps=1e-12,
                              conv_ln_eps=1e-5):
    B, T, D = xs.shape
    H = n_heads
    dk = D // H
    swish = lambda v: v * jax.nn.sigmoid(v)
    ln = _layer_norm_f32

    h = ln(xs, p["ln1_g"], p["ln1_b"], layer_norm_eps)
    h = swish(h @ p["ffn_m_w1"] + p["ffn_m_b1"]) @ p["ffn_m_w2"] + p["ffn_m_b2"]
    xs = xs + 0.5 * h

    res = xs
    h = ln(xs, p["ln2_g"], p["ln2_b"], layer_norm_eps)
    q = (h @ p["wq"] + p["bq"]).reshape(B, T, H, dk).transpose(0, 2, 1, 3)
    k = (h @ p["wk"] + p["bk"]).reshape(B, T, H, dk).transpose(0, 2, 1, 3)
    v = (h @ p["wv"] + p["bv"]).reshape(B, T, H, dk).transpose(0, 2, 1, 3)
    pos = (pos_embs.reshape(T, D) @ p["wv"] + p["bv"]).reshape(T, H, dk)
    pos = pos.transpose(1, 0, 2)
    bd = _rel_shift_ref(jnp.einsum("bhtd,hsd->bhts", q, pos))
    e = (jnp.einsum("bhtd,bhsd->bhts", q, k) + bd) / math.sqrt(dk)
    a = jax.nn.softmax(e, axis=-1)
    ctx = jnp.einsum("bhts,bhsd->bhtd", a, v).transpose(0, 2, 1, 3).reshape(B, T, D)
    xs = ctx @ p["wo"] + p["bo"] + res

    res = xs
    h = ln(xs, p["ln3_g"], p["ln3_b"], layer_norm_eps)
    h = h @ p["pw1_w"] + p["pw1_b"]
    h = h[..., :D] * jax.nn.sigmoid(h[..., D:])
    K = p["dw_w"].shape[0]
    pad = (K - 1) // 2
    hp = jnp.pad(h, ((0, 0), (pad, K - 1 - pad), (0, 0)))
    h = sum(hp[:, kk:kk + T, :] * p["dw_w"][kk] for kk in range(K)) + p["dw_b"]
    h = swish(ln(h, p["conv_ln_g"], p["conv_ln_b"], conv_ln_eps))
    xs = h @ p["pw2_w"] + p["pw2_b"] + res

    h = ln(xs, p["ln4_g"], p["ln4_b"], layer_norm_eps)
    h = swish(h @ p["ffn_w1"] + p["ffn_b1"]) @ p["ffn_w2"] + p["ffn_b2"]
    xs = xs + 0.5 * h
    return ln(xs, p["ln5_g"], p["ln5_b"], layer_norm_eps)


# ----------------------------------------------------------------------------
# deterministic parameter construction + run
# ----------------------------------------------------------------------------

def make_params(key, D, DFF, K):
    counter = [0]

    def nrm(shape, s=0.05):
        counter[0] += 1
        return (s * jax.random.normal(jax.random.fold_in(key, counter[0]),
                                      shape)).astype(jnp.float32)

    p = {}
    for i in range(1, 6):
        p[f"ln{i}_g"] = 1.0 + nrm((D,), 0.02)
        p[f"ln{i}_b"] = nrm((D,), 0.02)
    p["ffn_m_w1"], p["ffn_m_b1"] = nrm((D, DFF)), nrm((DFF,))
    p["ffn_m_w2"], p["ffn_m_b2"] = nrm((DFF, D)), nrm((D,))
    p["ffn_w1"], p["ffn_b1"] = nrm((D, DFF)), nrm((DFF,))
    p["ffn_w2"], p["ffn_b2"] = nrm((DFF, D)), nrm((D,))
    p["wq"], p["bq"] = nrm((D, D)), nrm((D,))
    p["wk"], p["bk"] = nrm((D, D)), nrm((D,))
    p["wv"], p["bv"] = nrm((D, D)), nrm((D,))
    p["wo"], p["bo"] = nrm((D, D)), nrm((D,))
    p["pw1_w"], p["pw1_b"] = nrm((D, 2 * D)), nrm((2 * D,))
    p["dw_w"], p["dw_b"] = nrm((K, D)), nrm((D,))   # dw_w[k, c] == torch weight[c, 0, k]
    p["conv_ln_g"] = 1.0 + nrm((D,), 0.02)
    p["conv_ln_b"] = nrm((D,), 0.02)
    p["pw2_w"], p["pw2_b"] = nrm((D, D)), nrm((D,))
    return p


if __name__ == "__main__":
    B, T, D, DFF, H, K = 2, 8, 32, 64, 4, 3
    key = jax.random.PRNGKey(0)
    k_x, k_pos, k_par = jax.random.split(key, 3)

    xs = jax.random.normal(k_x, (B, T, D), dtype=jnp.float32)
    pos_embs = jax.random.normal(k_pos, (T, 1, D), dtype=jnp.float32)
    params = make_params(k_par, D, DFF, K)

    fwd = jax.jit(functools.partial(conformer_block_forward, n_heads=H))
    out = jax.block_until_ready(fwd(xs, pos_embs, params))

    assert out.shape == (B, T, D)
    assert bool(jnp.all(jnp.isfinite(out)))

    ref = conformer_block_reference(xs, pos_embs, params, n_heads=H)
    np.testing.assert_allclose(np.asarray(out), np.asarray(ref),
                               rtol=2e-2, atol=2e-2)
    print("KERNEL_OK")
</pallas_src>

<mosaic_0001>
module attributes {stable_mosaic.version = 11 : i64} {
  func.func @_ffn_block_kernel(%arg0: i32, %arg1: memref<16x32xf32, #tpu.memory_space<vmem>>, %arg2: memref<1x32xf32, #tpu.memory_space<vmem>>, %arg3: memref<1x32xf32, #tpu.memory_space<vmem>>, %arg4: memref<32x64xf32, #tpu.memory_space<vmem>>, %arg5: memref<1x64xf32, #tpu.memory_space<vmem>>, %arg6: memref<64x32xf32, #tpu.memory_space<vmem>>, %arg7: memref<1x32xf32, #tpu.memory_space<vmem>>, %arg8: memref<1x32xf32, #tpu.memory_space<vmem>>, %arg9: memref<1x32xf32, #tpu.memory_space<vmem>>, %arg10: memref<16x32xf32, #tpu.memory_space<vmem>>) attributes {dimension_semantics = [#tpu.dimension_semantics<parallel>], iteration_bounds = array<i64: 1>, scalar_prefetch = 0 : i64, scratch_operands = 0 : i64, tpu.core_type = #tpu.core_type<tc>, window_params = [{transform_indices = @transform_0, window_bounds = array<i64: 16, 32>}, {pipeline_mode = #tpu.pipeline_mode<synchronous>, transform_indices = @transform_1, window_bounds = array<i64: 1, 32>}, {pipeline_mode = #tpu.pipeline_mode<synchronous>, transform_indices = @transform_2, window_bounds = array<i64: 1, 32>}, {pipeline_mode = #tpu.pipeline_mode<synchronous>, transform_indices = @transform_3, window_bounds = array<i64: 32, 64>}, {pipeline_mode = #tpu.pipeline_mode<synchronous>, transform_indices = @transform_4, window_bounds = array<i64: 1, 64>}, {pipeline_mode = #tpu.pipeline_mode<synchronous>, transform_indices = @transform_5, window_bounds = array<i64: 64, 32>}, {pipeline_mode = #tpu.pipeline_mode<synchronous>, transform_indices = @transform_6, window_bounds = array<i64: 1, 32>}, {pipeline_mode = #tpu.pipeline_mode<synchronous>, transform_indices = @transform_7, window_bounds = array<i64: 1, 32>}, {pipeline_mode = #tpu.pipeline_mode<synchronous>, transform_indices = @transform_8, window_bounds = array<i64: 1, 32>}, {transform_indices = @transform_9, window_bounds = array<i64: 16, 32>}]} {
    %c0 = arith.constant 0 : index
    %c0_0 = arith.constant 0 : index
    %0 = vector.load %arg1[%c0, %c0_0] : memref<16x32xf32, #tpu.memory_space<vmem>>, vector<16x32xf32>
    %c0_1 = arith.constant 0 : index
    %c0_2 = arith.constant 0 : index
    %1 = vector.load %arg2[%c0_1, %c0_2] : memref<1x32xf32, #tpu.memory_space<vmem>>, vector<1x32xf32>
    %c0_3 = arith.constant 0 : index
    %c0_4 = arith.constant 0 : index
    %2 = vector.load %arg3[%c0_3, %c0_4] : memref<1x32xf32, #tpu.memory_space<vmem>>, vector<1x32xf32>
    %cst = arith.constant dense<0.000000e+00> : vector<16xf32>
    %3 = vector.multi_reduction <add>, %0, %cst [1] : vector<16x32xf32> to vector<16xf32>
    %4 = vector.shape_cast %3 : vector<16xf32> to vector<16x1xf32>
    %cst_5 = arith.constant 3.200000e+01 : f32
    %5 = vector.broadcast %cst_5 : f32 to vector<16x1xf32>
    %6 = arith.divf %4, %5 : vector<16x1xf32>
    %7 = vector.broadcast %6 : vector<16x1xf32> to vector<16x32xf32>
    %8 = arith.subf %0, %7 : vector<16x32xf32>
    %9 = arith.mulf %8, %8 : vector<16x32xf32>
    %cst_6 = arith.constant dense<0.000000e+00> : vector<16xf32>
    %10 = vector.multi_reduction <add>, %9, %cst_6 [1] : vector<16x32xf32> to vector<16xf32>
    %11 = vector.shape_cast %10 : vector<16xf32> to vector<16x1xf32>
    %cst_7 = arith.constant 3.200000e+01 : f32
    %12 = vector.broadcast %cst_7 : f32 to vector<16x1xf32>
    %13 = arith.divf %11, %12 : vector<16x1xf32>
    %14 = vector.broadcast %6 : vector<16x1xf32> to vector<16x32xf32>
    %15 = arith.subf %0, %14 : vector<16x32xf32>
    %cst_8 = arith.constant 9.99999996E-13 : f32
    %16 = vector.broadcast %cst_8 : f32 to vector<16x1xf32>
    %17 = arith.addf %13, %16 : vector<16x1xf32>
    %18 = math.rsqrt %17 : vector<16x1xf32>
    %19 = vector.broadcast %18 : vector<16x1xf32> to vector<16x32xf32>
    %20 = arith.mulf %15, %19 : vector<16x32xf32>
    %21 = vector.broadcast %1 : vector<1x32xf32> to vector<16x32xf32>
    %22 = arith.mulf %20, %21 : vector<16x32xf32>
    %23 = vector.broadcast %2 : vector<1x32xf32> to vector<16x32xf32>
    %24 = arith.addf %22, %23 : vector<16x32xf32>
    %c0_9 = arith.constant 0 : index
    %c0_10 = arith.constant 0 : index
    %25 = vector.load %arg4[%c0_9, %c0_10] : memref<32x64xf32, #tpu.memory_space<vmem>>, vector<32x64xf32>
    %cst_11 = arith.constant dense<0.000000e+00> : vector<16x64xf32>
    %26 = tpu.matmul %24, %25, %cst_11 {dimension_numbers = #tpu.dot_dimension_numbers<[1], [0], [0], [1], [0, 0, 1, 1], [], []>} : vector<16x32xf32>, vector<32x64xf32>, vector<16x64xf32> -> vector<16x64xf32>
    %c0_12 = arith.constant 0 : index
    %c0_13 = arith.constant 0 : index
    %27 = vector.load %arg5[%c0_12, %c0_13] : memref<1x64xf32, #tpu.memory_space<vmem>>, vector<1x64xf32>
    %28 = vector.broadcast %27 : vector<1x64xf32> to vector<16x64xf32>
    %29 = arith.addf %26, %28 : vector<16x64xf32>
    %30 = arith.negf %29 : vector<16x64xf32>
    %31 = math.exp %30 : vector<16x64xf32>
    %cst_14 = arith.constant 1.000000e+00 : f32
    %32 = vector.broadcast %cst_14 : f32 to vector<16x64xf32>
    %33 = arith.addf %32, %31 : vector<16x64xf32>
    %34 = arith.divf %32, %33 : vector<16x64xf32>
    %35 = arith.mulf %29, %34 : vector<16x64xf32>
    %c0_15 = arith.constant 0 : index
    %c0_16 = arith.constant 0 : index
    %36 = vector.load %arg6[%c0_15, %c0_16] : memref<64x32xf32, #tpu.memory_space<vmem>>, vector<64x32xf32>
    %cst_17 = arith.constant dense<0.000000e+00> : vector<16x32xf32>
    %37 = tpu.matmul %35, %36, %cst_17 {dimension_numbers = #tpu.dot_dimension_numbers<[1], [0], [0], [1], [0, 0, 1, 1], [], []>} : vector<16x64xf32>, vector<64x32xf32>, vector<16x32xf32> -> vector<16x32xf32>
    %c0_18 = arith.constant 0 : index
    %c0_19 = arith.constant 0 : index
    %38 = vector.load %arg7[%c0_18, %c0_19] : memref<1x32xf32, #tpu.memory_space<vmem>>, vector<1x32xf32>
    %39 = vector.broadcast %38 : vector<1x32xf32> to vector<16x32xf32>
    %40 = arith.addf %37, %39 : vector<16x32xf32>
    %cst_20 = arith.constant 5.000000e-01 : f32
    %41 = vector.broadcast %cst_20 : f32 to vector<16x32xf32>
    %42 = arith.mulf %41, %40 : vector<16x32xf32>
    %43 = arith.addf %42, %0 : vector<16x32xf32>
    %c0_21 = arith.constant 0 : index
    %c0_22 = arith.constant 0 : index
    %44 = vector.load %arg10[%c0_21, %c0_22] : memref<16x32xf32, #tpu.memory_space<vmem>>, vector<16x32xf32>
    tpu.vector_store %arg10[%c0_21, %c0_22], %43 {strides = array<i32>} : memref<16x32xf32, #tpu.memory_space<vmem>>, vector<16x32xf32>,
    return
  }
  func.func @transform_0(%arg0: i32) -> (i32, i32) {
    %c0_i32 = arith.constant 0 : i32
    %c0_i32_0 = arith.constant 0 : i32
    return %arg0, %c0_i32 : i32, i32
  }
  func.func @transform_1(%arg0: i32) -> (i32, i32) {
    %c0_i32 = arith.constant 0 : i32
    %c0_i32_0 = arith.constant 0 : i32
    %c0_i32_1 = arith.constant 0 : i32
    return %c0_i32, %c0_i32_0 : i32, i32
  }
  func.func @transform_2(%arg0: i32) -> (i32, i32) {
    %c0_i32 = arith.constant 0 : i32
    %c0_i32_0 = arith.constant 0 : i32
    %c0_i32_1 = arith.constant 0 : i32
    return %c0_i32, %c0_i32_0 : i32, i32
  }
  func.func @transform_3(%arg0: i32) -> (i32, i32) {
    %c0_i32 = arith.constant 0 : i32
    %c0_i32_0 = arith.constant 0 : i32
    %c0_i32_1 = arith.constant 0 : i32
    return %c0_i32, %c0_i32_0 : i32, i32
  }
  func.func @transform_4(%arg0: i32) -> (i32, i32) {
    %c0_i32 = arith.constant 0 : i32
    %c0_i32_0 = arith.constant 0 : i32
    %c0_i32_1 = arith.constant 0 : i32
    return %c0_i32, %c0_i32_0 : i32, i32
  }
  func.func @transform_5(%arg0: i32) -> (i32, i32) {
    %c0_i32 = arith.constant 0 : i32
    %c0_i32_0 = arith.constant 0 : i32
    %c0_i32_1 = arith.constant 0 : i32
    return %c0_i32, %c0_i32_0 : i32, i32
  }
  func.func @transform_6(%arg0: i32) -> (i32, i32) {
    %c0_i32 = arith.constant 0 : i32
    %c0_i32_0 = arith.constant 0 : i32
    %c0_i32_1 = arith.constant 0 : i32
    return %c0_i32, %c0_i32_0 : i32, i32
  }
  func.func @transform_7(%arg0: i32) -> (i32, i32) {
    %c0_i32 = arith.constant 0 : i32
    %c0_i32_0 = arith.constant 0 : i32
    %c0_i32_1 = arith.constant 0 : i32
    return %c0_i32, %c0_i32_0 : i32, i32
  }
  func.func @transform_8(%arg0: i32) -> (i32, i32) {
    %c0_i32 = arith.constant 0 : i32
    %c0_i32_0 = arith.constant 0 : i32
    %c0_i32_1 = arith.constant 0 : i32
    return %c0_i32, %c0_i32_0 : i32, i32
  }
  func.func @transform_9(%arg0: i32) -> (i32, i32) {
    %c0_i32 = arith.constant 0 : i32
    %c0_i32_0 = arith.constant 0 : i32
    return %arg0, %c0_i32 : i32, i32
  }
}

module attributes {stable_mosaic.version = 11 : i64} {
  func.func @_linear_kernel(%arg0: i32, %arg1: memref<8x32xf32, #tpu.memory_space<vmem>>, %arg2: memref<32x32xf32, #tpu.memory_space<vmem>>, %arg3: memref<1x32xf32, #tpu.memory_space<vmem>>, %arg4: memref<8x32xf32, #tpu.memory_space<vmem>>) attributes {dimension_semantics = [#tpu.dimension_semantics<arbitrary>], iteration_bounds = array<i64: 1>, scalar_prefetch = 0 : i64, scratch_operands = 0 : i64, tpu.core_type = #tpu.core_type<tc>, window_params = [{pipeline_mode = #tpu.pipeline_mode<synchronous>, transform_indices = @transform_0, window_bounds = array<i64: 8, 32>}, {pipeline_mode = #tpu.pipeline_mode<synchronous>, transform_indices = @transform_1, window_bounds = array<i64: 32, 32>}, {pipeline_mode = #tpu.pipeline_mode<synchronous>, transform_indices = @transform_2, window_bounds = array<i64: 1, 32>}, {pipeline_mode = #tpu.pipeline_mode<synchronous>, transform_indices = @transform_3, window_bounds = array<i64: 8, 32>}]} {
    %c0 = arith.constant 0 : index
    %c0_0 = arith.constant 0 : index
    %0 = vector.load %arg1[%c0, %c0_0] : memref<8x32xf32, #tpu.memory_space<vmem>>, vector<8x32xf32>
    %c0_1 = arith.constant 0 : index
    %c0_2 = arith.constant 0 : index
    %1 = vector.load %arg2[%c0_1, %c0_2] : memref<32x32xf32, #tpu.memory_space<vmem>>, vector<32x32xf32>
    %cst = arith.constant dense<0.000000e+00> : vector<8x32xf32>
    %2 = tpu.matmul %0, %1, %cst {dimension_numbers = #tpu.dot_dimension_numbers<[1], [0], [0], [1], [0, 0, 1, 1], [], []>} : vector<8x32xf32>, vector<32x32xf32>, vector<8x32xf32> -> vector<8x32xf32>
    %c0_3 = arith.constant 0 : index
    %c0_4 = arith.constant 0 : index
    %3 = vector.load %arg3[%c0_3, %c0_4] : memref<1x32xf32, #tpu.memory_space<vmem>>, vector<1x32xf32>
    %4 = vector.broadcast %3 : vector<1x32xf32> to vector<8x32xf32>
    %5 = arith.addf %2, %4 : vector<8x32xf32>
    %c0_5 = arith.constant 0 : index
    %c0_6 = arith.constant 0 : index
    %6 = vector.load %arg4[%c0_5, %c0_6] : memref<8x32xf32, #tpu.memory_space<vmem>>, vector<8x32xf32>
    tpu.vector_store %arg4[%c0_5, %c0_6], %5 {strides = array<i32>} : memref<8x32xf32, #tpu.memory_space<vmem>>, vector<8x32xf32>,
    return
  }
  func.func @transform_0(%arg0: i32) -> (i32, i32) {
    %c0_i32 = arith.constant 0 : i32
    %c0_i32_0 = arith.constant 0 : i32
    %c0_i32_1 = arith.constant 0 : i32
    return %c0_i32, %c0_i32_0 : i32, i32
  }
  func.func @transform_1(%arg0: i32) -> (i32, i32) {
    %c0_i32 = arith.constant 0 : i32
    %c0_i32_0 = arith.constant 0 : i32
    %c0_i32_1 = arith.constant 0 : i32
    return %c0_i32, %c0_i32_0 : i32, i32
  }
  func.func @transform_2(%arg0: i32) -> (i32, i32) {
    %c0_i32 = arith.constant 0 : i32
    %c0_i32_0 = arith.constant 0 : i32
    %c0_i32_1 = arith.constant 0 : i32
    return %c0_i32, %c0_i32_0 : i32, i32
  }
  func.func @transform_3(%arg0: i32) -> (i32, i32) {
    %c0_i32 = arith.constant 0 : i32
    %c0_i32_0 = arith.constant 0 : i32
    %c0_i32_1 = arith.constant 0 : i32
    return %c0_i32, %c0_i32_0 : i32, i32
  }
}

module attributes {stable_mosaic.version = 11 : i64} {
  func.func @_conv_block_kernel(%arg0: i32, %arg1: memref<1x8x32xf32, #tpu.memory_space<vmem>>, %arg2: memref<1x32xf32, #tpu.memory_space<vmem>>, %arg3: memref<1x32xf32, #tpu.memory_space<vmem>>, %arg4: memref<32x64xf32, #tpu.memory_space<vmem>>, %arg5: memref<1x64xf32, #tpu.memory_space<vmem>>, %arg6: memref<3x32xf32, #tpu.memory_space<vmem>>, %arg7: memref<1x32xf32, #tpu.memory_space<vmem>>, %arg8: memref<1x32xf32, #tpu.memory_space<vmem>>, %arg9: memref<1x32xf32, #tpu.memory_space<vmem>>, %arg10: memref<32x32xf32, #tpu.memory_space<vmem>>, %arg11: memref<1x32xf32, #tpu.memory_space<vmem>>, %arg12: memref<1x8x32xf32, #tpu.memory_space<vmem>>) attributes {dimension_semantics = [#tpu.dimension_semantics<parallel>], iteration_bounds = array<i64: 2>, scalar_prefetch = 0 : i64, scratch_operands = 0 : i64, tpu.core_type = #tpu.core_type<tc>, window_params = [{transform_indices = @transform_0, window_bounds = array<i64: 1, 8, 32>}, {pipeline_mode = #tpu.pipeline_mode<synchronous>, transform_indices = @transform_1, window_bounds = array<i64: 1, 32>}, {pipeline_mode = #tpu.pipeline_mode<synchronous>, transform_indices = @transform_2, window_bounds = array<i64: 1, 32>}, {pipeline_mode = #tpu.pipeline_mode<synchronous>, transform_indices = @transform_3, window_bounds = array<i64: 32, 64>}, {pipeline_mode = #tpu.pipeline_mode<synchronous>, transform_indices = @transform_4, window_bounds = array<i64: 1, 64>}, {pipeline_mode = #tpu.pipeline_mode<synchronous>, transform_indices = @transform_5, window_bounds = array<i64: 3, 32>}, {pipeline_mode = #tpu.pipeline_mode<synchronous>, transform_indices = @transform_6, window_bounds = array<i64: 1, 32>}, {pipeline_mode = #tpu.pipeline_mode<synchronous>, transform_indices = @transform_7, window_bounds = array<i64: 1, 32>}, {pipeline_mode = #tpu.pipeline_mode<synchronous>, transform_indices = @transform_8, window_bounds = array<i64: 1, 32>}, {pipeline_mode = #tpu.pipeline_mode<synchronous>, transform_indices = @transform_9, window_bounds = array<i64: 32, 32>}, {pipeline_mode = #tpu.pipeline_mode<synchronous>, transform_indices = @transform_10, window_bounds = array<i64: 1, 32>}, {transform_indices = @transform_11, window_bounds = array<i64: 1, 8, 32>}]} {
    %c0 = arith.constant 0 : index
    %c0_0 = arith.constant 0 : index
    %c0_1 = arith.constant 0 : index
    %0 = vector.load %arg1[%c0, %c0_0, %c0_1] : memref<1x8x32xf32, #tpu.memory_space<vmem>>, vector<1x8x32xf32>
    %1 = vector.shape_cast %0 : vector<1x8x32xf32> to vector<8x32xf32>
    %c0_2 = arith.constant 0 : index
    %c0_3 = arith.constant 0 : index
    %2 = vector.load %arg2[%c0_2, %c0_3] : memref<1x32xf32, #tpu.memory_space<vmem>>, vector<1x32xf32>
    %c0_4 = arith.constant 0 : index
    %c0_5 = arith.constant 0 : index
    %3 = vector.load %arg3[%c0_4, %c0_5] : memref<1x32xf32, #tpu.memory_space<vmem>>, vector<1x32xf32>
    %cst = arith.constant dense<0.000000e+00> : vector<8xf32>
    %4 = vector.multi_reduction <add>, %1, %cst [1] : vector<8x32xf32> to vector<8xf32>
    %5 = vector.shape_cast %4 : vector<8xf32> to vector<8x1xf32>
    %cst_6 = arith.constant 3.200000e+01 : f32
    %6 = vector.broadcast %cst_6 : f32 to vector<8x1xf32>
    %7 = arith.divf %5, %6 : vector<8x1xf32>
    %8 = vector.broadcast %7 : vector<8x1xf32> to vector<8x32xf32>
    %9 = arith.subf %1, %8 : vector<8x32xf32>
    %10 = arith.mulf %9, %9 : vector<8x32xf32>
    %cst_7 = arith.constant dense<0.000000e+00> : vector<8xf32>
    %11 = vector.multi_reduction <add>, %10, %cst_7 [1] : vector<8x32xf32> to vector<8xf32>
    %12 = vector.shape_cast %11 : vector<8xf32> to vector<8x1xf32>
    %cst_8 = arith.constant 3.200000e+01 : f32
    %13 = vector.broadcast %cst_8 : f32 to vector<8x1xf32>
    %14 = arith.divf %12, %13 : vector<8x1xf32>
    %15 = vector.broadcast %7 : vector<8x1xf32> to vector<8x32xf32>
    %16 = arith.subf %1, %15 : vector<8x32xf32>
    %cst_9 = arith.constant 9.99999996E-13 : f32
    %17 = vector.broadcast %cst_9 : f32 to vector<8x1xf32>
    %18 = arith.addf %14, %17 : vector<8x1xf32>
    %19 = math.rsqrt %18 : vector<8x1xf32>
    %20 = vector.broadcast %19 : vector<8x1xf32> to vector<8x32xf32>
    %21 = arith.mulf %16, %20 : vector<8x32xf32>
    %22 = vector.broadcast %2 : vector<1x32xf32> to vector<8x32xf32>
    %23 = arith.mulf %21, %22 : vector<8x32xf32>
    %24 = vector.broadcast %3 : vector<1x32xf32> to vector<8x32xf32>
    %25 = arith.addf %23, %24 : vector<8x32xf32>
    %c0_10 = arith.constant 0 : index
    %c0_11 = arith.constant 0 : index
    %26 = vector.load %arg4[%c0_10, %c0_11] : memref<32x64xf32, #tpu.memory_space<vmem>>, vector<32x64xf32>
    %cst_12 = arith.constant dense<0.000000e+00> : vector<8x64xf32>
    %27 = tpu.matmul %25, %26, %cst_12 {dimension_numbers = #tpu.dot_dimension_numbers<[1], [0], [0], [1], [0, 0, 1, 1], [], []>} : vector<8x32xf32>, vector<32x64xf32>, vector<8x64xf32> -> vector<8x64xf32>
    %c0_13 = arith.constant 0 : index
    %c0_14 = arith.constant 0 : index
    %28 = vector.load %arg5[%c0_13, %c0_14] : memref<1x64xf32, #tpu.memory_space<vmem>>, vector<1x64xf32>
    %29 = vector.broadcast %28 : vector<1x64xf32> to vector<8x64xf32>
    %30 = arith.addf %27, %29 : vector<8x64xf32>
    %31 = vector.extract_strided_slice %30 {offsets = [0, 0], sizes = [8, 32], strides = [1, 1]} : vector<8x64xf32> to vector<8x32xf32>
    %32 = vector.extract_strided_slice %30 {offsets = [0, 32], sizes = [8, 32], strides = [1, 1]} : vector<8x64xf32> to vector<8x32xf32>
    %33 = arith.negf %32 : vector<8x32xf32>
    %34 = math.exp %33 : vector<8x32xf32>
    %cst_15 = arith.constant 1.000000e+00 : f32
    %35 = vector.broadcast %cst_15 : f32 to vector<8x32xf32>
    %36 = arith.addf %35, %34 : vector<8x32xf32>
    %37 = arith.divf %35, %36 : vector<8x32xf32>
    %38 = arith.mulf %31, %37 : vector<8x32xf32>
    %cst_16 = arith.constant 0.000000e+00 : f32
    %39 = vector.broadcast %cst_16 : f32 to vector<1x32xf32>
    %cst_17 = arith.constant 0.000000e+00 : f32
    %40 = vector.broadcast %cst_17 : f32 to vector<1x32xf32>
    %41 = tpu.concatenate %39, %38, %40 in 0 : vector<1x32xf32>, vector<8x32xf32>, vector<1x32xf32> -> vector<10x32xf32>
    %c0_18 = arith.constant 0 : index
    %c0_19 = arith.constant 0 : index
    %42 = vector.load %arg6[%c0_18, %c0_19] : memref<3x32xf32, #tpu.memory_space<vmem>>, vector<3x32xf32>
    %cst_20 = arith.constant 0.000000e+00 : f32
    %43 = vector.broadcast %cst_20 : f32 to vector<8x32xf32>
    %44 = vector.extract_strided_slice %41 {offsets = [0, 0], sizes = [8, 32], strides = [1, 1]} : vector<10x32xf32> to vector<8x32xf32>
    %45 = vector.extract_strided_slice %42 {offsets = [0, 0], sizes = [1, 32], strides = [1, 1]} : vector<3x32xf32> to vector<1x32xf32>
    %46 = vector.broadcast %45 : vector<1x32xf32> to vector<8x32xf32>
    %47 = arith.mulf %44, %46 : vector<8x32xf32>
    %48 = arith.addf %43, %47 : vector<8x32xf32>
    %49 = vector.extract_strided_slice %41 {offsets = [1, 0], sizes = [8, 32], strides = [1, 1]} : vector<10x32xf32> to vector<8x32xf32>
    %50 = vector.extract_strided_slice %42 {offsets = [1, 0], sizes = [1, 32], strides = [1, 1]} : vector<3x32xf32> to vector<1x32xf32>
    %51 = vector.broadcast %50 : vector<1x32xf32> to vector<8x32xf32>
    %52 = arith.mulf %49, %51 : vector<8x32xf32>
    %53 = arith.addf %48, %52 : vector<8x32xf32>
    %54 = vector.extract_strided_slice %41 {offsets = [2, 0], sizes = [8, 32], strides = [1, 1]} : vector<10x32xf32> to vector<8x32xf32>
    %55 = vector.extract_strided_slice %42 {offsets = [2, 0], sizes = [1, 32], strides = [1, 1]} : vector<3x32xf32> to vector<1x32xf32>
    %56 = vector.broadcast %55 : vector<1x32xf32> to vector<8x32xf32>
    %57 = arith.mulf %54, %56 : vector<8x32xf32>
    %58 = arith.addf %53, %57 : vector<8x32xf32>
    %c0_21 = arith.constant 0 : index
    %c0_22 = arith.constant 0 : index
    %59 = vector.load %arg7[%c0_21, %c0_22] : memref<1x32xf32, #tpu.memory_space<vmem>>, vector<1x32xf32>
    %60 = vector.broadcast %59 : vector<1x32xf32> to vector<8x32xf32>
    %61 = arith.addf %58, %60 : vector<8x32xf32>
    %c0_23 = arith.constant 0 : index
    %c0_24 = arith.constant 0 : index
    %62 = vector.load %arg8[%c0_23, %c0_24] : memref<1x32xf32, #tpu.memory_space<vmem>>, vector<1x32xf32>
    %c0_25 = arith.constant 0 : index
    %c0_26 = arith.constant 0 : index
    %63 = vector.load %arg9[%c0_25, %c0_26] : memref<1x32xf32, #tpu.memory_space<vmem>>, vector<1x32xf32>
    %cst_27 = arith.constant dense<0.000000e+00> : vector<8xf32>
    %64 = vector.multi_reduction <add>, %61, %cst_27 [1] : vector<8x32xf32> to vector<8xf32>
    %65 = vector.shape_cast %64 : vector<8xf32> to vector<8x1xf32>
    %cst_28 = arith.constant 3.200000e+01 : f32
    %66 = vector.broadcast %cst_28 : f32 to vector<8x1xf32>
    %67 = arith.divf %65, %66 : vector<8x1xf32>
    %68 = vector.broadcast %67 : vector<8x1xf32> to vector<8x32xf32>
    %69 = arith.subf %61, %68 : vector<8x32xf32>
    %70 = arith.mulf %69, %69 : vector<8x32xf32>
    %cst_29 = arith.constant dense<0.000000e+00> : vector<8xf32>
    %71 = vector.multi_reduction <add>, %70, %cst_29 [1] : vector<8x32xf32> to vector<8xf32>
    %72 = vector.shape_cast %71 : vector<8xf32> to vector<8x1xf32>
    %cst_30 = arith.constant 3.200000e+01 : f32
    %73 = vector.broadcast %cst_30 : f32 to vector<8x1xf32>
    %74 = arith.divf %72, %73 : vector<8x1xf32>
    %75 = vector.broadcast %67 : vector<8x1xf32> to vector<8x32xf32>
    %76 = arith.subf %61, %75 : vector<8x32xf32>
    %cst_31 = arith.constant 9.99999974E-6 : f32
    %77 = vector.broadcast %cst_31 : f32 to vector<8x1xf32>
    %78 = arith.addf %74, %77 : vector<8x1xf32>
    %79 = math.rsqrt %78 : vector<8x1xf32>
    %80 = vector.broadcast %79 : vector<8x1xf32> to vector<8x32xf32>
    %81 = arith.mulf %76, %80 : vector<8x32xf32>
    %82 = vector.broadcast %62 : vector<1x32xf32> to vector<8x32xf32>
    %83 = arith.mulf %81, %82 : vector<8x32xf32>
    %84 = vector.broadcast %63 : vector<1x32xf32> to vector<8x32xf32>
    %85 = arith.addf %83, %84 : vector<8x32xf32>
    %86 = arith.negf %85 : vector<8x32xf32>
    %87 = math.exp %86 : vector<8x32xf32>
    %cst_32 = arith.constant 1.000000e+00 : f32
    %88 = vector.broadcast %cst_32 : f32 to vector<8x32xf32>
    %89 = arith.addf %88, %87 : vector<8x32xf32>
    %90 = arith.divf %88, %89 : vector<8x32xf32>
    %91 = arith.mulf %85, %90 : vector<8x32xf32>
    %c0_33 = arith.constant 0 : index
    %c0_34 = arith.constant 0 : index
    %92 = vector.load %arg10[%c0_33, %c0_34] : memref<32x32xf32, #tpu.memory_space<vmem>>, vector<32x32xf32>
    %cst_35 = arith.constant dense<0.000000e+00> : vector<8x32xf32>
    %93 = tpu.matmul %91, %92, %cst_35 {dimension_numbers = #tpu.dot_dimension_numbers<[1], [0], [0], [1], [0, 0, 1, 1], [], []>} : vector<8x32xf32>, vector<32x32xf32>, vector<8x32xf32> -> vector<8x32xf32>
    %c0_36 = arith.constant 0 : index
    %c0_37 = arith.constant 0 : index
    %94 = vector.load %arg11[%c0_36, %c0_37] : memref<1x32xf32, #tpu.memory_space<vmem>>, vector<1x32xf32>
    %95 = vector.broadcast %94 : vector<1x32xf32> to vector<8x32xf32>
    %96 = arith.addf %93, %95 : vector<8x32xf32>
    %97 = arith.addf %96, %1 : vector<8x32xf32>
    %c0_38 = arith.constant 0 : index
    %c0_39 = arith.constant 0 : index
    %c0_40 = arith.constant 0 : index
    %98 = vector.load %arg12[%c0_38, %c0_39, %c0_40] : memref<1x8x32xf32, #tpu.memory_space<vmem>>, vector<1x8x32xf32>
    %99 = vector.shape_cast %98 : vector<1x8x32xf32> to vector<8x32xf32>
    %100 = vector.shape_cast %97 : vector<8x32xf32> to vector<1x8x32xf32>
    tpu.vector_store %arg12[%c0_38, %c0_39, %c0_40], %100 {strides = array<i32>} : memref<1x8x32xf32, #tpu.memory_space<vmem>>, vector<1x8x32xf32>,
    return
  }
  func.func @transform_0(%arg0: i32) -> (i32, i32, i32) {
    %c0_i32 = arith.constant 0 : i32
    %c0_i32_0 = arith.constant 0 : i32
    %c0_i32_1 = arith.constant 0 : i32
    return %arg0, %c0_i32, %c0_i32_0 : i32, i32, i32
  }
  func.func @transform_1(%arg0: i32) -> (i32, i32) {
    %c0_i32 = arith.constant 0 : i32
    %c0_i32_0 = arith.constant 0 : i32
    %c0_i32_1 = arith.constant 0 : i32
    return %c0_i32, %c0_i32_0 : i32, i32
  }
  func.func @transform_2(%arg0: i32) -> (i32, i32) {
    %c0_i32 = arith.constant 0 : i32
    %c0_i32_0 = arith.constant 0 : i32
    %c0_i32_1 = arith.constant 0 : i32
    return %c0_i32, %c0_i32_0 : i32, i32
  }
  func.func @transform_3(%arg0: i32) -> (i32, i32) {
    %c0_i32 = arith.constant 0 : i32
    %c0_i32_0 = arith.constant 0 : i32
    %c0_i32_1 = arith.constant 0 : i32
    return %c0_i32, %c0_i32_0 : i32, i32
  }
  func.func @transform_4(%arg0: i32) -> (i32, i32) {
    %c0_i32 = arith.constant 0 : i32
    %c0_i32_0 = arith.constant 0 : i32
    %c0_i32_1 = arith.constant 0 : i32
    return %c0_i32, %c0_i32_0 : i32, i32
  }
  func.func @transform_5(%arg0: i32) -> (i32, i32) {
    %c0_i32 = arith.constant 0 : i32
    %c0_i32_0 = arith.constant 0 : i32
    %c0_i32_1 = arith.constant 0 : i32
    return %c0_i32, %c0_i32_0 : i32, i32
  }
  func.func @transform_6(%arg0: i32) -> (i32, i32) {
    %c0_i32 = arith.constant 0 : i32
    %c0_i32_0 = arith.constant 0 : i32
    %c0_i32_1 = arith.constant 0 : i32
    return %c0_i32, %c0_i32_0 : i32, i32
  }
  func.func @transform_7(%arg0: i32) -> (i32, i32) {
    %c0_i32 = arith.constant 0 : i32
    %c0_i32_0 = arith.constant 0 : i32
    %c0_i32_1 = arith.constant 0 : i32
    return %c0_i32, %c0_i32_0 : i32, i32
  }
  func.func @transform_8(%arg0: i32) -> (i32, i32) {
    %c0_i32 = arith.constant 0 : i32
    %c0_i32_0 = arith.constant 0 : i32
    %c0_i32_1 = arith.constant 0 : i32
    return %c0_i32, %c0_i32_0 : i32, i32
  }
  func.func @transform_9(%arg0: i32) -> (i32, i32) {
    %c0_i32 = arith.constant 0 : i32
    %c0_i32_0 = arith.constant 0 : i32
    %c0_i32_1 = arith.constant 0 : i32
    return %c0_i32, %c0_i32_0 : i32, i32
  }
  func.func @transform_10(%arg0: i32) -> (i32, i32) {
    %c0_i32 = arith.constant 0 : i32
    %c0_i32_0 = arith.constant 0 : i32
    %c0_i32_1 = arith.constant 0 : i32
    return %c0_i32, %c0_i32_0 : i32, i32
  }
  func.func @transform_11(%arg0: i32) -> (i32, i32, i32) {
    %c0_i32 = arith.constant 0 : i32
    %c0_i32_0 = arith.constant 0 : i32
    %c0_i32_1 = arith.constant 0 : i32
    return %arg0, %c0_i32, %c0_i32_0 : i32, i32, i32
  }
}

module attributes {stable_mosaic.version = 11 : i64} {
  func.func @_mha_block_kernel(%arg0: i32, %arg1: memref<1x8x32xf32, #tpu.memory_space<vmem>>, %arg2: memref<1x32xf32, #tpu.memory_space<vmem>>, %arg3: memref<1x32xf32, #tpu.memory_space<vmem>>, %arg4: memref<32x96xf32, #tpu.memory_space<vmem>>, %arg5: memref<1x96xf32, #tpu.memory_space<vmem>>, %arg6: memref<8x32xf32, #tpu.memory_space<vmem>>, %arg7: memref<32x32xf32, #tpu.memory_space<vmem>>, %arg8: memref<1x32xf32, #tpu.memory_space<vmem>>, %arg9: memref<1x8x32xf32, #tpu.memory_space<vmem>>) attributes {dimension_semantics = [#tpu.dimension_semantics<parallel>], iteration_bounds = array<i64: 2>, scalar_prefetch = 0 : i64, scratch_operands = 0 : i64, tpu.core_type = #tpu.core_type<tc>, window_params = [{transform_indices = @transform_0, window_bounds = array<i64: 1, 8, 32>}, {pipeline_mode = #tpu.pipeline_mode<synchronous>, transform_indices = @transform_1, window_bounds = array<i64: 1, 32>}, {pipeline_mode = #tpu.pipeline_mode<synchronous>, transform_indices = @transform_2, window_bounds = array<i64: 1, 32>}, {pipeline_mode = #tpu.pipeline_mode<synchronous>, transform_indices = @transform_3, window_bounds = array<i64: 32, 96>}, {pipeline_mode = #tpu.pipeline_mode<synchronous>, transform_indices = @transform_4, window_bounds = array<i64: 1, 96>}, {pipeline_mode = #tpu.pipeline_mode<synchronous>, transform_indices = @transform_5, window_bounds = array<i64: 8, 32>}, {pipeline_mode = #tpu.pipeline_mode<synchronous>, transform_indices = @transform_6, window_bounds = array<i64: 32, 32>}, {pipeline_mode = #tpu.pipeline_mode<synchronous>, transform_indices = @transform_7, window_bounds = array<i64: 1, 32>}, {transform_indices = @transform_8, window_bounds = array<i64: 1, 8, 32>}]} {
    %c0 = arith.constant 0 : index
    %c0_0 = arith.constant 0 : index
    %c0_1 = arith.constant 0 : index
    %0 = vector.load %arg1[%c0, %c0_0, %c0_1] : memref<1x8x32xf32, #tpu.memory_space<vmem>>, vector<1x8x32xf32>
    %1 = vector.shape_cast %0 : vector<1x8x32xf32> to vector<8x32xf32>
    %c0_2 = arith.constant 0 : index
    %c0_3 = arith.constant 0 : index
    %2 = vector.load %arg2[%c0_2, %c0_3] : memref<1x32xf32, #tpu.memory_space<vmem>>, vector<1x32xf32>
    %c0_4 = arith.constant 0 : index
    %c0_5 = arith.constant 0 : index
    %3 = vector.load %arg3[%c0_4, %c0_5] : memref<1x32xf32, #tpu.memory_space<vmem>>, vector<1x32xf32>
    %cst = arith.constant dense<0.000000e+00> : vector<8xf32>
    %4 = vector.multi_reduction <add>, %1, %cst [1] : vector<8x32xf32> to vector<8xf32>
    %5 = vector.shape_cast %4 : vector<8xf32> to vector<8x1xf32>
    %cst_6 = arith.constant 3.200000e+01 : f32
    %6 = vector.broadcast %cst_6 : f32 to vector<8x1xf32>
    %7 = arith.divf %5, %6 : vector<8x1xf32>
    %8 = vector.broadcast %7 : vector<8x1xf32> to vector<8x32xf32>
    %9 = arith.subf %1, %8 : vector<8x32xf32>
    %10 = arith.mulf %9, %9 : vector<8x32xf32>
    %cst_7 = arith.constant dense<0.000000e+00> : vector<8xf32>
    %11 = vector.multi_reduction <add>, %10, %cst_7 [1] : vector<8x32xf32> to vector<8xf32>
    %12 = vector.shape_cast %11 : vector<8xf32> to vector<8x1xf32>
    %cst_8 = arith.constant 3.200000e+01 : f32
    %13 = vector.broadcast %cst_8 : f32 to vector<8x1xf32>
    %14 = arith.divf %12, %13 : vector<8x1xf32>
    %15 = vector.broadcast %7 : vector<8x1xf32> to vector<8x32xf32>
    %16 = arith.subf %1, %15 : vector<8x32xf32>
    %cst_9 = arith.constant 9.99999996E-13 : f32
    %17 = vector.broadcast %cst_9 : f32 to vector<8x1xf32>
    %18 = arith.addf %14, %17 : vector<8x1xf32>
    %19 = math.rsqrt %18 : vector<8x1xf32>
    %20 = vector.broadcast %19 : vector<8x1xf32> to vector<8x32xf32>
    %21 = arith.mulf %16, %20 : vector<8x32xf32>
    %22 = vector.broadcast %2 : vector<1x32xf32> to vector<8x32xf32>
    %23 = arith.mulf %21, %22 : vector<8x32xf32>
    %24 = vector.broadcast %3 : vector<1x32xf32> to vector<8x32xf32>
    %25 = arith.addf %23, %24 : vector<8x32xf32>
    %c0_10 = arith.constant 0 : index
    %c0_11 = arith.constant 0 : index
    %26 = vector.load %arg4[%c0_10, %c0_11] : memref<32x96xf32, #tpu.memory_space<vmem>>, vector<32x96xf32>
    %cst_12 = arith.constant dense<0.000000e+00> : vector<8x96xf32>
    %27 = tpu.matmul %25, %26, %cst_12 {dimension_numbers = #tpu.dot_dimension_numbers<[1], [0], [0], [1], [0, 0, 1, 1], [], []>} : vector<8x32xf32>, vector<32x96xf32>, vector<8x96xf32> -> vector<8x96xf32>
    %c0_13 = arith.constant 0 : index
    %c0_14 = arith.constant 0 : index
    %28 = vector.load %arg5[%c0_13, %c0_14] : memref<1x96xf32, #tpu.memory_space<vmem>>, vector<1x96xf32>
    %29 = vector.broadcast %28 : vector<1x96xf32> to vector<8x96xf32>
    %30 = arith.addf %27, %29 : vector<8x96xf32>
    %31 = vector.extract_strided_slice %30 {offsets = [0, 0], sizes = [8, 32], strides = [1, 1]} : vector<8x96xf32> to vector<8x32xf32>
    %32 = vector.extract_strided_slice %30 {offsets = [0, 32], sizes = [8, 32], strides = [1, 1]} : vector<8x96xf32> to vector<8x32xf32>
    %33 = vector.extract_strided_slice %30 {offsets = [0, 64], sizes = [8, 32], strides = [1, 1]} : vector<8x96xf32> to vector<8x32xf32>
    %c0_15 = arith.constant 0 : index
    %c0_16 = arith.constant 0 : index
    %34 = vector.load %arg6[%c0_15, %c0_16] : memref<8x32xf32, #tpu.memory_space<vmem>>, vector<8x32xf32>
    %35 = tpu.iota {dimensions = array<i32: 0>} : vector<8x8xi32>
    %36 = tpu.iota {dimensions = array<i32: 1>} : vector<8x8xi32>
    %c1_i32 = arith.constant 1 : i32
    %37 = vector.broadcast %c1_i32 : i32 to vector<8x8xi32>
    %38 = arith.addi %35, %37 : vector<8x8xi32>
    %c8_i32 = arith.constant 8 : i32
    %c0_i32 = arith.constant 0 : i32
    %39 = arith.cmpi eq, %c8_i32, %c0_i32 : i32
    %c1_i32_17 = arith.constant 1 : i32
    %40 = arith.select %39, %c1_i32_17, %c8_i32 : i32
    %41 = vector.broadcast %40 : i32 to vector<8x8xi32>
    %42 = arith.remsi %38, %41 : vector<8x8xi32>
    %c0_i32_18 = arith.constant 0 : i32
    %43 = vector.broadcast %c0_i32_18 : i32 to vector<8x8xi32>
    %44 = arith.cmpi ne, %42, %43 : vector<8x8xi32>
    %c0_i32_19 = arith.constant 0 : i32
    %45 = vector.broadcast %c0_i32_19 : i32 to vector<8x8xi32>
    %46 = arith.cmpi slt, %42, %45 : vector<8x8xi32>
    %c0_i32_20 = arith.constant 0 : i32
    %47 = arith.cmpi slt, %40, %c0_i32_20 : i32
    %48 = vector.broadcast %47 : i1 to vector<8x8xi1>
    %49 = vector.broadcast %48 : vector<8x8xi1> to vector<8x8xi1>
    %50 = arith.xori %46, %49 : vector<8x8xi1>
    %51 = arith.andi %50, %44 : vector<8x8xi1>
    %52 = vector.broadcast %40 : i32 to vector<8x8xi32>
    %53 = arith.addi %42, %52 : vector<8x8xi32>
    %54 = arith.select %51, %53, %42 : vector<8x8xi1>, vector<8x8xi32>
    %55 = vector.extract_strided_slice %31 {offsets = [0, 0], sizes = [8, 8], strides = [1, 1]} : vector<8x32xf32> to vector<8x8xf32>
    %56 = vector.extract_strided_slice %32 {offsets = [0, 0], sizes = [8, 8], strides = [1, 1]} : vector<8x32xf32> to vector<8x8xf32>
    %57 = vector.extract_strided_slice %33 {offsets = [0, 0], sizes = [8, 8], strides = [1, 1]} : vector<8x32xf32> to vector<8x8xf32>
    %58 = vector.extract_strided_slice %34 {offsets = [0, 0], sizes = [8, 8], strides = [1, 1]} : vector<8x32xf32> to vector<8x8xf32>
    %59 = tpu.transpose %56, [1, 0] : vector<8x8xf32> -> vector<8x8xf32>
    %cst_21 = arith.constant dense<0.000000e+00> : vector<8x8xf32>
    %60 = tpu.matmul %55, %59, %cst_21 {dimension_numbers = #tpu.dot_dimension_numbers<[1], [0], [0], [1], [0, 0, 1, 1], [], []>} : vector<8x8xf32>, vector<8x8xf32>, vector<8x8xf32> -> vector<8x8xf32>
    %61 = tpu.transpose %58, [1, 0] : vector<8x8xf32> -> vector<8x8xf32>
    %cst_22 = arith.constant dense<0.000000e+00> : vector<8x8xf32>
    %62 = tpu.matmul %55, %61, %cst_22 {dimension_numbers = #tpu.dot_dimension_numbers<[1], [0], [0], [1], [0, 0, 1, 1], [], []>} : vector<8x8xf32>, vector<8x8xf32>, vector<8x8xf32> -> vector<8x8xf32>
    %63 = vector.extract_strided_slice %62 {offsets = [0, 7], sizes = [8, 1], strides = [1, 1]} : vector<8x8xf32> to vector<8x1xf32>
    %64 = vector.extract_strided_slice %62 {offsets = [0, 0], sizes = [8, 7], strides = [1, 1]} : vector<8x8xf32> to vector<8x7xf32>
    %65 = tpu.concatenate %63, %64 in 1 : vector<8x1xf32>, vector<8x7xf32> -> vector<8x8xf32>
    %c0_i32_23 = arith.constant 0 : i32
    %66 = vector.broadcast %c0_i32_23 : i32 to vector<8x8xi32>
    %67 = arith.shrsi %54, %66 : vector<8x8xi32>
    %c1_i32_24 = arith.constant 1 : i32
    %68 = vector.broadcast %c1_i32_24 : i32 to vector<8x8xi32>
    %69 = arith.andi %67, %68 : vector<8x8xi32>
    %c1_i32_25 = arith.constant 1 : i32
    %70 = vector.broadcast %c1_i32_25 : i32 to vector<8x8xi32>
    %71 = arith.cmpi eq, %69, %70 : vector<8x8xi32>
    %72 = arith.select %71, %65, %62 : vector<8x8xi1>, vector<8x8xf32>
    %73 = vector.extract_strided_slice %72 {offsets = [0, 6], sizes = [8, 2], strides = [1, 1]} : vector<8x8xf32> to vector<8x2xf32>
    %74 = vector.extract_strided_slice %72 {offsets = [0, 0], sizes = [8, 6], strides = [1, 1]} : vector<8x8xf32> to vector<8x6xf32>
    %75 = tpu.concatenate %73, %74 in 1 : vector<8x2xf32>, vector<8x6xf32> -> vector<8x8xf32>
    %c1_i32_26 = arith.constant 1 : i32
    %76 = vector.broadcast %c1_i32_26 : i32 to vector<8x8xi32>
    %77 = arith.shrsi %54, %76 : vector<8x8xi32>
    %c1_i32_27 = arith.constant 1 : i32
    %78 = vector.broadcast %c1_i32_27 : i32 to vector<8x8xi32>
    %79 = arith.andi %77, %78 : vector<8x8xi32>
    %c1_i32_28 = arith.constant 1 : i32
    %80 = vector.broadcast %c1_i32_28 : i32 to vector<8x8xi32>
    %81 = arith.cmpi eq, %79, %80 : vector<8x8xi32>
    %82 = arith.select %81, %75, %72 : vector<8x8xi1>, vector<8x8xf32>
    %83 = vector.extract_strided_slice %82 {offsets = [0, 4], sizes = [8, 4], strides = [1, 1]} : vector<8x8xf32> to vector<8x4xf32>
    %84 = vector.extract_strided_slice %82 {offsets = [0, 0], sizes = [8, 4], strides = [1, 1]} : vector<8x8xf32> to vector<8x4xf32>
    %85 = tpu.concatenate %83, %84 in 1 : vector<8x4xf32>, vector<8x4xf32> -> vector<8x8xf32>
    %c2_i32 = arith.constant 2 : i32
    %86 = vector.broadcast %c2_i32 : i32 to vector<8x8xi32>
    %87 = arith.shrsi %54, %86 : vector<8x8xi32>
    %c1_i32_29 = arith.constant 1 : i32
    %88 = vector.broadcast %c1_i32_29 : i32 to vector<8x8xi32>
    %89 = arith.andi %87, %88 : vector<8x8xi32>
    %c1_i32_30 = arith.constant 1 : i32
    %90 = vector.broadcast %c1_i32_30 : i32 to vector<8x8xi32>
    %91 = arith.cmpi eq, %89, %90 : vector<8x8xi32>
    %92 = arith.select %91, %85, %82 : vector<8x8xi1>, vector<8x8xf32>
    %93 = vector.extract_strided_slice %92 {offsets = [1, 0], sizes = [7, 8], strides = [1, 1]} : vector<8x8xf32> to vector<7x8xf32>
    %94 = vector.extract_strided_slice %92 {offsets = [0, 0], sizes = [1, 8], strides = [1, 1]} : vector<8x8xf32> to vector<1x8xf32>
    %95 = tpu.concatenate %93, %94 in 0 : vector<7x8xf32>, vector<1x8xf32> -> vector<8x8xf32>
    %96 = arith.cmpi sle, %36, %35 : vector<8x8xi32>
    %c1_i32_31 = arith.constant 1 : i32
    %97 = vector.broadcast %c1_i32_31 : i32 to vector<8x8xi32>
    %98 = arith.addi %35, %97 : vector<8x8xi32>
    %99 = arith.cmpi eq, %36, %98 : vector<8x8xi32>
    %cst_32 = arith.constant 0.000000e+00 : f32
    %100 = vector.broadcast %cst_32 : f32 to vector<8x8xf32>
    %101 = arith.select %99, %100, %95 : vector<8x8xi1>, vector<8x8xf32>
    %102 = arith.select %96, %92, %101 : vector<8x8xi1>, vector<8x8xf32>
    %103 = arith.addf %60, %102 : vector<8x8xf32>
    %cst_33 = arith.constant dense<0xFF800000> : vector<8xf32>
    %104 = vector.multi_reduction <maximumf>, %103, %cst_33 [1] : vector<8x8xf32> to vector<8xf32>
    %105 = vector.shape_cast %104 : vector<8xf32> to vector<8x1xf32>
    %106 = vector.broadcast %105 : vector<8x1xf32> to vector<8x8xf32>
    %107 = arith.subf %103, %106 : vector<8x8xf32>
    %108 = math.exp %107 : vector<8x8xf32>
    %cst_34 = arith.constant dense<0.000000e+00> : vector<8xf32>
    %109 = vector.multi_reduction <add>, %108, %cst_34 [1] : vector<8x8xf32> to vector<8xf32>
    %110 = vector.shape_cast %109 : vector<8xf32> to vector<8x1xf32>
    %111 = tpu.reciprocal %110 {approx = true} : vector<8x1xf32> -> vector<8x1xf32>
    %112 = vector.broadcast %111 : vector<8x1xf32> to vector<8x8xf32>
    %113 = arith.mulf %108, %112 : vector<8x8xf32>
    %cst_35 = arith.constant dense<0.000000e+00> : vector<8x8xf32>
    %114 = tpu.matmul %113, %57, %cst_35 {dimension_numbers = #tpu.dot_dimension_numbers<[1], [0], [0], [1], [0, 0, 1, 1], [], []>} : vector<8x8xf32>, vector<8x8xf32>, vector<8x8xf32> -> vector<8x8xf32>
    %115 = vector.extract_strided_slice %31 {offsets = [0, 8], sizes = [8, 8], strides = [1, 1]} : vector<8x32xf32> to vector<8x8xf32>
    %116 = vector.extract_strided_slice %32 {offsets = [0, 8], sizes = [8, 8], strides = [1, 1]} : vector<8x32xf32> to vector<8x8xf32>
    %117 = vector.extract_strided_slice %33 {offsets = [0, 8], sizes = [8, 8], strides = [1, 1]} : vector<8x32xf32> to vector<8x8xf32>
    %118 = vector.extract_strided_slice %34 {offsets = [0, 8], sizes = [8, 8], strides = [1, 1]} : vector<8x32xf32> to vector<8x8xf32>
    %119 = tpu.transpose %116, [1, 0] : vector<8x8xf32> -> vector<8x8xf32>
    %cst_36 = arith.constant dense<0.000000e+00> : vector<8x8xf32>
    %120 = tpu.matmul %115, %119, %cst_36 {dimension_numbers = #tpu.dot_dimension_numbers<[1], [0], [0], [1], [0, 0, 1, 1], [], []>} : vector<8x8xf32>, vector<8x8xf32>, vector<8x8xf32> -> vector<8x8xf32>
    %121 = tpu.transpose %118, [1, 0] : vector<8x8xf32> -> vector<8x8xf32>
    %cst_37 = arith.constant dense<0.000000e+00> : vector<8x8xf32>
    %122 = tpu.matmul %115, %121, %cst_37 {dimension_numbers = #tpu.dot_dimension_numbers<[1], [0], [0], [1], [0, 0, 1, 1], [], []>} : vector<8x8xf32>, vector<8x8xf32>, vector<8x8xf32> -> vector<8x8xf32>
    %123 = vector.extract_strided_slice %122 {offsets = [0, 7], sizes = [8, 1], strides = [1, 1]} : vector<8x8xf32> to vector<8x1xf32>
    %124 = vector.extract_strided_slice %122 {offsets = [0, 0], sizes = [8, 7], strides = [1, 1]} : vector<8x8xf32> to vector<8x7xf32>
    %125 = tpu.concatenate %123, %124 in 1 : vector<8x1xf32>, vector<8x7xf32> -> vector<8x8xf32>
    %c0_i32_38 = arith.constant 0 : i32
    %126 = vector.broadcast %c0_i32_38 : i32 to vector<8x8xi32>
    %127 = arith.shrsi %54, %126 : vector<8x8xi32>
    %c1_i32_39 = arith.constant 1 : i32
    %128 = vector.broadcast %c1_i32_39 : i32 to vector<8x8xi32>
    %129 = arith.andi %127, %128 : vector<8x8xi32>
    %c1_i32_40 = arith.constant 1 : i32
    %130 = vector.broadcast %c1_i32_40 : i32 to vector<8x8xi32>
    %131 = arith.cmpi eq, %129, %130 : vector<8x8xi32>
    %132 = arith.select %131, %125, %122 : vector<8x8xi1>, vector<8x8xf32>
    %133 = vector.extract_strided_slice %132 {offsets = [0, 6], sizes = [8, 2], strides = [1, 1]} : vector<8x8xf32> to vector<8x2xf32>
    %134 = vector.extract_strided_slice %132 {offsets = [0, 0], sizes = [8, 6], strides = [1, 1]} : vector<8x8xf32> to vector<8x6xf32>
    %135 = tpu.concatenate %133, %134 in 1 : vector<8x2xf32>, vector<8x6xf32> -> vector<8x8xf32>
    %c1_i32_41 = arith.constant 1 : i32
    %136 = vector.broadcast %c1_i32_41 : i32 to vector<8x8xi32>
    %137 = arith.shrsi %54, %136 : vector<8x8xi32>
    %c1_i32_42 = arith.constant 1 : i32
    %138 = vector.broadcast %c1_i32_42 : i32 to vector<8x8xi32>
    %139 = arith.andi %137, %138 : vector<8x8xi32>
    %c1_i32_43 = arith.constant 1 : i32
    %140 = vector.broadcast %c1_i32_43 : i32 to vector<8x8xi32>
    %141 = arith.cmpi eq, %139, %140 : vector<8x8xi32>
    %142 = arith.select %141, %135, %132 : vector<8x8xi1>, vector<8x8xf32>
    %143 = vector.extract_strided_slice %142 {offsets = [0, 4], sizes = [8, 4], strides = [1, 1]} : vector<8x8xf32> to vector<8x4xf32>
    %144 = vector.extract_strided_slice %142 {offsets = [0, 0], sizes = [8, 4], strides = [1, 1]} : vector<8x8xf32> to vector<8x4xf32>
    %145 = tpu.concatenate %143, %144 in 1 : vector<8x4xf32>, vector<8x4xf32> -> vector<8x8xf32>
    %c2_i32_44 = arith.constant 2 : i32
    %146 = vector.broadcast %c2_i32_44 : i32 to vector<8x8xi32>
    %147 = arith.shrsi %54, %146 : vector<8x8xi32>
    %c1_i32_45 = arith.constant 1 : i32
    %148 = vector.broadcast %c1_i32_45 : i32 to vector<8x8xi32>
    %149 = arith.andi %147, %148 : vector<8x8xi32>
    %c1_i32_46 = arith.constant 1 : i32
    %150 = vector.broadcast %c1_i32_46 : i32 to vector<8x8xi32>
    %151 = arith.cmpi eq, %149, %150 : vector<8x8xi32>
    %152 = arith.select %151, %145, %142 : vector<8x8xi1>, vector<8x8xf32>
    %153 = vector.extract_strided_slice %152 {offsets = [1, 0], sizes = [7, 8], strides = [1, 1]} : vector<8x8xf32> to vector<7x8xf32>
    %154 = vector.extract_strided_slice %152 {offsets = [0, 0], sizes = [1, 8], strides = [1, 1]} : vector<8x8xf32> to vector<1x8xf32>
    %155 = tpu.concatenate %153, %154 in 0 : vector<7x8xf32>, vector<1x8xf32> -> vector<8x8xf32>
    %156 = arith.cmpi sle, %36, %35 : vector<8x8xi32>
    %c1_i32_47 = arith.constant 1 : i32
    %157 = vector.broadcast %c1_i32_47 : i32 to vector<8x8xi32>
    %158 = arith.addi %35, %157 : vector<8x8xi32>
    %159 = arith.cmpi eq, %36, %158 : vector<8x8xi32>
    %cst_48 = arith.constant 0.000000e+00 : f32
    %160 = vector.broadcast %cst_48 : f32 to vector<8x8xf32>
    %161 = arith.select %159, %160, %155 : vector<8x8xi1>, vector<8x8xf32>
    %162 = arith.select %156, %152, %161 : vector<8x8xi1>, vector<8x8xf32>
    %163 = arith.addf %120, %162 : vector<8x8xf32>
    %cst_49 = arith.constant dense<0xFF800000> : vector<8xf32>
    %164 = vector.multi_reduction <maximumf>, %163, %cst_49 [1] : vector<8x8xf32> to vector<8xf32>
    %165 = vector.shape_cast %164 : vector<8xf32> to vector<8x1xf32>
    %166 = vector.broadcast %165 : vector<8x1xf32> to vector<8x8xf32>
    %167 = arith.subf %163, %166 : vector<8x8xf32>
    %168 = math.exp %167 : vector<8x8xf32>
    %cst_50 = arith.constant dense<0.000000e+00> : vector<8xf32>
    %169 = vector.multi_reduction <add>, %168, %cst_50 [1] : vector<8x8xf32> to vector<8xf32>
    %170 = vector.shape_cast %169 : vector<8xf32> to vector<8x1xf32>
    %171 = tpu.reciprocal %170 {approx = true} : vector<8x1xf32> -> vector<8x1xf32>
    %172 = vector.broadcast %171 : vector<8x1xf32> to vector<8x8xf32>
    %173 = arith.mulf %168, %172 : vector<8x8xf32>
    %cst_51 = arith.constant dense<0.000000e+00> : vector<8x8xf32>
    %174 = tpu.matmul %173, %117, %cst_51 {dimension_numbers = #tpu.dot_dimension_numbers<[1], [0], [0], [1], [0, 0, 1, 1], [], []>} : vector<8x8xf32>, vector<8x8xf32>, vector<8x8xf32> -> vector<8x8xf32>
    %175 = vector.extract_strided_slice %31 {offsets = [0, 16], sizes = [8, 8], strides = [1, 1]} : vector<8x32xf32> to vector<8x8xf32>
    %176 = vector.extract_strided_slice %32 {offsets = [0, 16], sizes = [8, 8], strides = [1, 1]} : vector<8x32xf32> to vector<8x8xf32>
    %177 = vector.extract_strided_slice %33 {offsets = [0, 16], sizes = [8, 8], strides = [1, 1]} : vector<8x32xf32> to vector<8x8xf32>
    %178 = vector.extract_strided_slice %34 {offsets = [0, 16], sizes = [8, 8], strides = [1, 1]} : vector<8x32xf32> to vector<8x8xf32>
    %179 = tpu.transpose %176, [1, 0] : vector<8x8xf32> -> vector<8x8xf32>
    %cst_52 = arith.constant dense<0.000000e+00> : vector<8x8xf32>
    %180 = tpu.matmul %175, %179, %cst_52 {dimension_numbers = #tpu.dot_dimension_numbers<[1], [0], [0], [1], [0, 0, 1, 1], [], []>} : vector<8x8xf32>, vector<8x8xf32>, vector<8x8xf32> -> vector<8x8xf32>
    %181 = tpu.transpose %178, [1, 0] : vector<8x8xf32> -> vector<8x8xf32>
    %cst_53 = arith.constant dense<0.000000e+00> : vector<8x8xf32>
    %182 = tpu.matmul %175, %181, %cst_53 {dimension_numbers = #tpu.dot_dimension_numbers<[1], [0], [0], [1], [0, 0, 1, 1], [], []>} : vector<8x8xf32>, vector<8x8xf32>, vector<8x8xf32> -> vector<8x8xf32>
    %183 = vector.extract_strided_slice %182 {offsets = [0, 7], sizes = [8, 1], strides = [1, 1]} : vector<8x8xf32> to vector<8x1xf32>
    %184 = vector.extract_strided_slice %182 {offsets = [0, 0], sizes = [8, 7], strides = [1, 1]} : vector<8x8xf32> to vector<8x7xf32>
    %185 = tpu.concatenate %183, %184 in 1 : vector<8x1xf32>, vector<8x7xf32> -> vector<8x8xf32>
    %c0_i32_54 = arith.constant 0 : i32
    %186 = vector.broadcast %c0_i32_54 : i32 to vector<8x8xi32>
    %187 = arith.shrsi %54, %186 : vector<8x8xi32>
    %c1_i32_55 = arith.constant 1 : i32
    %188 = vector.broadcast %c1_i32_55 : i32 to vector<8x8xi32>
    %189 = arith.andi %187, %188 : vector<8x8xi32>
    %c1_i32_56 = arith.constant 1 : i32
    %190 = vector.broadcast %c1_i32_56 : i32 to vector<8x8xi32>
    %191 = arith.cmpi eq, %189, %190 : vector<8x8xi32>
    %192 = arith.select %191, %185, %182 : vector<8x8xi1>, vector<8x8xf32>
    %193 = vector.extract_strided_slice %192 {offsets = [0, 6], sizes = [8, 2], strides = [1, 1]} : vector<8x8xf32> to vector<8x2xf32>
    %194 = vector.extract_strided_slice %192 {offsets = [0, 0], sizes = [8, 6], strides = [1, 1]} : vector<8x8xf32> to vector<8x6xf32>
    %195 = tpu.concatenate %193, %194 in 1 : vector<8x2xf32>, vector<8x6xf32> -> vector<8x8xf32>
    %c1_i32_57 = arith.constant 1 : i32
    %196 = vector.broadcast %c1_i32_57 : i32 to vector<8x8xi32>
    %197 = arith.shrsi %54, %196 : vector<8x8xi32>
    %c1_i32_58 = arith.constant 1 : i32
    %198 = vector.broadcast %c1_i32_58 : i32 to vector<8x8xi32>
    %199 = arith.andi %197, %198 : vector<8x8xi32>
    %c1_i32_59 = arith.constant 1 : i32
    %200 = vector.broadcast %c1_i32_59 : i32 to vector<8x8xi32>
    %201 = arith.cmpi eq, %199, %200 : vector<8x8xi32>
    %202 = arith.select %201, %195, %192 : vector<8x8xi1>, vector<8x8xf32>
    %203 = vector.extract_strided_slice %202 {offsets = [0, 4], sizes = [8, 4], strides = [1, 1]} : vector<8x8xf32> to vector<8x4xf32>
    %204 = vector.extract_strided_slice %202 {offsets = [0, 0], sizes = [8, 4], strides = [1, 1]} : vector<8x8xf32> to vector<8x4xf32>
    %205 = tpu.concatenate %203, %204 in 1 : vector<8x4xf32>, vector<8x4xf32> -> vector<8x8xf32>
    %c2_i32_60 = arith.constant 2 : i32
    %206 = vector.broadcast %c2_i32_60 : i32 to vector<8x8xi32>
    %207 = arith.shrsi %54, %206 : vector<8x8xi32>
    %c1_i32_61 = arith.constant 1 : i32
    %208 = vector.broadcast %c1_i32_61 : i32 to vector<8x8xi32>
    %209 = arith.andi %207, %208 : vector<8x8xi32>
    %c1_i32_62 = arith.constant 1 : i32
    %210 = vector.broadcast %c1_i32_62 : i32 to vector<8x8xi32>
    %211 = arith.cmpi eq, %209, %210 : vector<8x8xi32>
    %212 = arith.select %211, %205, %202 : vector<8x8xi1>, vector<8x8xf32>
    %213 = vector.extract_strided_slice %212 {offsets = [1, 0], sizes = [7, 8], strides = [1, 1]} : vector<8x8xf32> to vector<7x8xf32>
    %214 = vector.extract_strided_slice %212 {offsets = [0, 0], sizes = [1, 8], strides = [1, 1]} : vector<8x8xf32> to vector<1x8xf32>
    %215 = tpu.concatenate %213, %214 in 0 : vector<7x8xf32>, vector<1x8xf32> -> vector<8x8xf32>
    %216 = arith.cmpi sle, %36, %35 : vector<8x8xi32>
    %c1_i32_63 = arith.constant 1 : i32
    %217 = vector.broadcast %c1_i32_63 : i32 to vector<8x8xi32>
    %218 = arith.addi %35, %217 : vector<8x8xi32>
    %219 = arith.cmpi eq, %36, %218 : vector<8x8xi32>
    %cst_64 = arith.constant 0.000000e+00 : f32
    %220 = vector.broadcast %cst_64 : f32 to vector<8x8xf32>
    %221 = arith.select %219, %220, %215 : vector<8x8xi1>, vector<8x8xf32>
    %222 = arith.select %216, %212, %221 : vector<8x8xi1>, vector<8x8xf32>
    %223 = arith.addf %180, %222 : vector<8x8xf32>
    %cst_65 = arith.constant dense<0xFF800000> : vector<8xf32>
    %224 = vector.multi_reduction <maximumf>, %223, %cst_65 [1] : vector<8x8xf32> to vector<8xf32>
    %225 = vector.shape_cast %224 : vector<8xf32> to vector<8x1xf32>
    %226 = vector.broadcast %225 : vector<8x1xf32> to vector<8x8xf32>
    %227 = arith.subf %223, %226 : vector<8x8xf32>
    %228 = math.exp %227 : vector<8x8xf32>
    %cst_66 = arith.constant dense<0.000000e+00> : vector<8xf32>
    %229 = vector.multi_reduction <add>, %228, %cst_66 [1] : vector<8x8xf32> to vector<8xf32>
    %230 = vector.shape_cast %229 : vector<8xf32> to vector<8x1xf32>
    %231 = tpu.reciprocal %230 {approx = true} : vector<8x1xf32> -> vector<8x1xf32>
    %232 = vector.broadcast %231 : vector<8x1xf32> to vector<8x8xf32>
    %233 = arith.mulf %228, %232 : vector<8x8xf32>
    %cst_67 = arith.constant dense<0.000000e+00> : vector<8x8xf32>
    %234 = tpu.matmul %233, %177, %cst_67 {dimension_numbers = #tpu.dot_dimension_numbers<[1], [0], [0], [1], [0, 0, 1, 1], [], []>} : vector<8x8xf32>, vector<8x8xf32>, vector<8x8xf32> -> vector<8x8xf32>
    %235 = vector.extract_strided_slice %31 {offsets = [0, 24], sizes = [8, 8], strides = [1, 1]} : vector<8x32xf32> to vector<8x8xf32>
    %236 = vector.extract_strided_slice %32 {offsets = [0, 24], sizes = [8, 8], strides = [1, 1]} : vector<8x32xf32> to vector<8x8xf32>
    %237 = vector.extract_strided_slice %33 {offsets = [0, 24], sizes = [8, 8], strides = [1, 1]} : vector<8x32xf32> to vector<8x8xf32>
    %238 = vector.extract_strided_slice %34 {offsets = [0, 24], sizes = [8, 8], strides = [1, 1]} : vector<8x32xf32> to vector<8x8xf32>
    %239 = tpu.transpose %236, [1, 0] : vector<8x8xf32> -> vector<8x8xf32>
    %cst_68 = arith.constant dense<0.000000e+00> : vector<8x8xf32>
    %240 = tpu.matmul %235, %239, %cst_68 {dimension_numbers = #tpu.dot_dimension_numbers<[1], [0], [0], [1], [0, 0, 1, 1], [], []>} : vector<8x8xf32>, vector<8x8xf32>, vector<8x8xf32> -> vector<8x8xf32>
    %241 = tpu.transpose %238, [1, 0] : vector<8x8xf32> -> vector<8x8xf32>
    %cst_69 = arith.constant dense<0.000000e+00> : vector<8x8xf32>
    %242 = tpu.matmul %235, %241, %cst_69 {dimension_numbers = #tpu.dot_dimension_numbers<[1], [0], [0], [1], [0, 0, 1, 1], [], []>} : vector<8x8xf32>, vector<8x8xf32>, vector<8x8xf32> -> vector<8x8xf32>
    %243 = vector.extract_strided_slice %242 {offsets = [0, 7], sizes = [8, 1], strides = [1, 1]} : vector<8x8xf32> to vector<8x1xf32>
    %244 = vector.extract_strided_slice %242 {offsets = [0, 0], sizes = [8, 7], strides = [1, 1]} : vector<8x8xf32> to vector<8x7xf32>
    %245 = tpu.concatenate %243, %244 in 1 : vector<8x1xf32>, vector<8x7xf32> -> vector<8x8xf32>
    %c0_i32_70 = arith.constant 0 : i32
    %246 = vector.broadcast %c0_i32_70 : i32 to vector<8x8xi32>
    %247 = arith.shrsi %54, %246 : vector<8x8xi32>
    %c1_i32_71 = arith.constant 1 : i32
    %248 = vector.broadcast %c1_i32_71 : i32 to vector<8x8xi32>
    %249 = arith.andi %247, %248 : vector<8x8xi32>
    %c1_i32_72 = arith.constant 1 : i32
    %250 = vector.broadcast %c1_i32_72 : i32 to vector<8x8xi32>
    %251 = arith.cmpi eq, %249, %250 : vector<8x8xi32>
    %252 = arith.select %251, %245, %242 : vector<8x8xi1>, vector<8x8xf32>
    %253 = vector.extract_strided_slice %252 {offsets = [0, 6], sizes = [8, 2], strides = [1, 1]} : vector<8x8xf32> to vector<8x2xf32>
    %254 = vector.extract_strided_slice %252 {offsets = [0, 0], sizes = [8, 6], strides = [1, 1]} : vector<8x8xf32> to vector<8x6xf32>
    %255 = tpu.concatenate %253, %254 in 1 : vector<8x2xf32>, vector<8x6xf32> -> vector<8x8xf32>
    %c1_i32_73 = arith.constant 1 : i32
    %256 = vector.broadcast %c1_i32_73 : i32 to vector<8x8xi32>
    %257 = arith.shrsi %54, %256 : vector<8x8xi32>
    %c1_i32_74 = arith.constant 1 : i32
    %258 = vector.broadcast %c1_i32_74 : i32 to vector<8x8xi32>
    %259 = arith.andi %257, %258 : vector<8x8xi32>
    %c1_i32_75 = arith.constant 1 : i32
    %260 = vector.broadcast %c1_i32_75 : i32 to vector<8x8xi32>
    %261 = arith.cmpi eq, %259, %260 : vector<8x8xi32>
    %262 = arith.select %261, %255, %252 : vector<8x8xi1>, vector<8x8xf32>
    %263 = vector.extract_strided_slice %262 {offsets = [0, 4], sizes = [8, 4], strides = [1, 1]} : vector<8x8xf32> to vector<8x4xf32>
    %264 = vector.extract_strided_slice %262 {offsets = [0, 0], sizes = [8, 4], strides = [1, 1]} : vector<8x8xf32> to vector<8x4xf32>
    %265 = tpu.concatenate %263, %264 in 1 : vector<8x4xf32>, vector<8x4xf32> -> vector<8x8xf32>
    %c2_i32_76 = arith.constant 2 : i32
    %266 = vector.broadcast %c2_i32_76 : i32 to vector<8x8xi32>
    %267 = arith.shrsi %54, %266 : vector<8x8xi32>
    %c1_i32_77 = arith.constant 1 : i32
    %268 = vector.broadcast %c1_i32_77 : i32 to vector<8x8xi32>
    %269 = arith.andi %267, %268 : vector<8x8xi32>
    %c1_i32_78 = arith.constant 1 : i32
    %270 = vector.broadcast %c1_i32_78 : i32 to vector<8x8xi32>
    %271 = arith.cmpi eq, %269, %270 : vector<8x8xi32>
    %272 = arith.select %271, %265, %262 : vector<8x8xi1>, vector<8x8xf32>
    %273 = vector.extract_strided_slice %272 {offsets = [1, 0], sizes = [7, 8], strides = [1, 1]} : vector<8x8xf32> to vector<7x8xf32>
    %274 = vector.extract_strided_slice %272 {offsets = [0, 0], sizes = [1, 8], strides = [1, 1]} : vector<8x8xf32> to vector<1x8xf32>
    %275 = tpu.concatenate %273, %274 in 0 : vector<7x8xf32>, vector<1x8xf32> -> vector<8x8xf32>
    %276 = arith.cmpi sle, %36, %35 : vector<8x8xi32>
    %c1_i32_79 = arith.constant 1 : i32
    %277 = vector.broadcast %c1_i32_79 : i32 to vector<8x8xi32>
    %278 = arith.addi %35, %277 : vector<8x8xi32>
    %279 = arith.cmpi eq, %36, %278 : vector<8x8xi32>
    %cst_80 = arith.constant 0.000000e+00 : f32
    %280 = vector.broadcast %cst_80 : f32 to vector<8x8xf32>
    %281 = arith.select %279, %280, %275 : vector<8x8xi1>, vector<8x8xf32>
    %282 = arith.select %276, %272, %281 : vector<8x8xi1>, vector<8x8xf32>
    %283 = arith.addf %240, %282 : vector<8x8xf32>
    %cst_81 = arith.constant dense<0xFF800000> : vector<8xf32>
    %284 = vector.multi_reduction <maximumf>, %283, %cst_81 [1] : vector<8x8xf32> to vector<8xf32>
    %285 = vector.shape_cast %284 : vector<8xf32> to vector<8x1xf32>
    %286 = vector.broadcast %285 : vector<8x1xf32> to vector<8x8xf32>
    %287 = arith.subf %283, %286 : vector<8x8xf32>
    %288 = math.exp %287 : vector<8x8xf32>
    %cst_82 = arith.constant dense<0.000000e+00> : vector<8xf32>
    %289 = vector.multi_reduction <add>, %288, %cst_82 [1] : vector<8x8xf32> to vector<8xf32>
    %290 = vector.shape_cast %289 : vector<8xf32> to vector<8x1xf32>
    %291 = tpu.reciprocal %290 {approx = true} : vector<8x1xf32> -> vector<8x1xf32>
    %292 = vector.broadcast %291 : vector<8x1xf32> to vector<8x8xf32>
    %293 = arith.mulf %288, %292 : vector<8x8xf32>
    %cst_83 = arith.constant dense<0.000000e+00> : vector<8x8xf32>
    %294 = tpu.matmul %293, %237, %cst_83 {dimension_numbers = #tpu.dot_dimension_numbers<[1], [0], [0], [1], [0, 0, 1, 1], [], []>} : vector<8x8xf32>, vector<8x8xf32>, vector<8x8xf32> -> vector<8x8xf32>
    %295 = tpu.concatenate %114, %174, %234, %294 in 1 : vector<8x8xf32>, vector<8x8xf32>, vector<8x8xf32>, vector<8x8xf32> -> vector<8x32xf32>
    %c0_84 = arith.constant 0 : index
    %c0_85 = arith.constant 0 : index
    %296 = vector.load %arg7[%c0_84, %c0_85] : memref<32x32xf32, #tpu.memory_space<vmem>>, vector<32x32xf32>
    %cst_86 = arith.constant dense<0.000000e+00> : vector<8x32xf32>
    %297 = tpu.matmul %295, %296, %cst_86 {dimension_numbers = #tpu.dot_dimension_numbers<[1], [0], [0], [1], [0, 0, 1, 1], [], []>} : vector<8x32xf32>, vector<32x32xf32>, vector<8x32xf32> -> vector<8x32xf32>
    %c0_87 = arith.constant 0 : index
    %c0_88 = arith.constant 0 : index
    %298 = vector.load %arg8[%c0_87, %c0_88] : memref<1x32xf32, #tpu.memory_space<vmem>>, vector<1x32xf32>
    %299 = vector.broadcast %298 : vector<1x32xf32> to vector<8x32xf32>
    %300 = arith.addf %297, %299 : vector<8x32xf32>
    %301 = arith.addf %300, %1 : vector<8x32xf32>
    %c0_89 = arith.constant 0 : index
    %c0_90 = arith.constant 0 : index
    %c0_91 = arith.constant 0 : index
    %302 = vector.load %arg9[%c0_89, %c0_90, %c0_91] : memref<1x8x32xf32, #tpu.memory_space<vmem>>, vector<1x8x32xf32>
    %303 = vector.shape_cast %302 : vector<1x8x32xf32> to vector<8x32xf32>
    %304 = vector.shape_cast %301 : vector<8x32xf32> to vector<1x8x32xf32>
    tpu.vector_store %arg9[%c0_89, %c0_90, %c0_91], %304 {strides = array<i32>} : memref<1x8x32xf32, #tpu.memory_space<vmem>>, vector<1x8x32xf32>,
    return
  }
  func.func @transform_0(%arg0: i32) -> (i32, i32, i32) {
    %c0_i32 = arith.constant 0 : i32
    %c0_i32_0 = arith.constant 0 : i32
    %c0_i32_1 = arith.constant 0 : i32
    return %arg0, %c0_i32, %c0_i32_0 : i32, i32, i32
  }
  func.func @transform_1(%arg0: i32) -> (i32, i32) {
    %c0_i32 = arith.constant 0 : i32
    %c0_i32_0 = arith.constant 0 : i32
    %c0_i32_1 = arith.constant 0 : i32
    return %c0_i32, %c0_i32_0 : i32, i32
  }
  func.func @transform_2(%arg0: i32) -> (i32, i32) {
    %c0_i32 = arith.constant 0 : i32
    %c0_i32_0 = arith.constant 0 : i32
    %c0_i32_1 = arith.constant 0 : i32
    return %c0_i32, %c0_i32_0 : i32, i32
  }
  func.func @transform_3(%arg0: i32) -> (i32, i32) {
    %c0_i32 = arith.constant 0 : i32
    %c0_i32_0 = arith.constant 0 : i32
    %c0_i32_1 = arith.constant 0 : i32
    return %c0_i32, %c0_i32_0 : i32, i32
  }
  func.func @transform_4(%arg0: i32) -> (i32, i32) {
    %c0_i32 = arith.constant 0 : i32
    %c0_i32_0 = arith.constant 0 : i32
    %c0_i32_1 = arith.constant 0 : i32
    return %c0_i32, %c0_i32_0 : i32, i32
  }
  func.func @transform_5(%arg0: i32) -> (i32, i32) {
    %c0_i32 = arith.constant 0 : i32
    %c0_i32_0 = arith.constant 0 : i32
    %c0_i32_1 = arith.constant 0 : i32
    return %c0_i32, %c0_i32_0 : i32, i32
  }
  func.func @transform_6(%arg0: i32) -> (i32, i32) {
    %c0_i32 = arith.constant 0 : i32
    %c0_i32_0 = arith.constant 0 : i32
    %c0_i32_1 = arith.constant 0 : i32
    return %c0_i32, %c0_i32_0 : i32, i32
  }
  func.func @transform_7(%arg0: i32) -> (i32, i32) {
    %c0_i32 = arith.constant 0 : i32
    %c0_i32_0 = arith.constant 0 : i32
    %c0_i32_1 = arith.constant 0 : i32
    return %c0_i32, %c0_i32_0 : i32, i32
  }
  func.func @transform_8(%arg0: i32) -> (i32, i32, i32) {
    %c0_i32 = arith.constant 0 : i32
    %c0_i32_0 = arith.constant 0 : i32
    %c0_i32_1 = arith.constant 0 : i32
    return %arg0, %c0_i32, %c0_i32_0 : i32, i32, i32
  }
}

module attributes {stable_mosaic.version = 11 : i64} {
  func.func @_ffn_block_kernel(%arg0: i32, %arg1: memref<16x32xf32, #tpu.memory_space<vmem>>, %arg2: memref<1x32xf32, #tpu.memory_space<vmem>>, %arg3: memref<1x32xf32, #tpu.memory_space<vmem>>, %arg4: memref<32x64xf32, #tpu.memory_space<vmem>>, %arg5: memref<1x64xf32, #tpu.memory_space<vmem>>, %arg6: memref<64x32xf32, #tpu.memory_space<vmem>>, %arg7: memref<1x32xf32, #tpu.memory_space<vmem>>, %arg8: memref<1x32xf32, #tpu.memory_space<vmem>>, %arg9: memref<1x32xf32, #tpu.memory_space<vmem>>, %arg10: memref<16x32xf32, #tpu.memory_space<vmem>>) attributes {dimension_semantics = [#tpu.dimension_semantics<parallel>], iteration_bounds = array<i64: 1>, scalar_prefetch = 0 : i64, scratch_operands = 0 : i64, tpu.core_type = #tpu.core_type<tc>, window_params = [{transform_indices = @transform_0, window_bounds = array<i64: 16, 32>}, {pipeline_mode = #tpu.pipeline_mode<synchronous>, transform_indices = @transform_1, window_bounds = array<i64: 1, 32>}, {pipeline_mode = #tpu.pipeline_mode<synchronous>, transform_indices = @transform_2, window_bounds = array<i64: 1, 32>}, {pipeline_mode = #tpu.pipeline_mode<synchronous>, transform_indices = @transform_3, window_bounds = array<i64: 32, 64>}, {pipeline_mode = #tpu.pipeline_mode<synchronous>, transform_indices = @transform_4, window_bounds = array<i64: 1, 64>}, {pipeline_mode = #tpu.pipeline_mode<synchronous>, transform_indices = @transform_5, window_bounds = array<i64: 64, 32>}, {pipeline_mode = #tpu.pipeline_mode<synchronous>, transform_indices = @transform_6, window_bounds = array<i64: 1, 32>}, {pipeline_mode = #tpu.pipeline_mode<synchronous>, transform_indices = @transform_7, window_bounds = array<i64: 1, 32>}, {pipeline_mode = #tpu.pipeline_mode<synchronous>, transform_indices = @transform_8, window_bounds = array<i64: 1, 32>}, {transform_indices = @transform_9, window_bounds = array<i64: 16, 32>}]} {
    %c0 = arith.constant 0 : index
    %c0_0 = arith.constant 0 : index
    %0 = vector.load %arg1[%c0, %c0_0] : memref<16x32xf32, #tpu.memory_space<vmem>>, vector<16x32xf32>
    %c0_1 = arith.constant 0 : index
    %c0_2 = arith.constant 0 : index
    %1 = vector.load %arg2[%c0_1, %c0_2] : memref<1x32xf32, #tpu.memory_space<vmem>>, vector<1x32xf32>
    %c0_3 = arith.constant 0 : index
    %c0_4 = arith.constant 0 : index
    %2 = vector.load %arg3[%c0_3, %c0_4] : memref<1x32xf32, #tpu.memory_space<vmem>>, vector<1x32xf32>
    %cst = arith.constant dense<0.000000e+00> : vector<16xf32>
    %3 = vector.multi_reduction <add>, %0, %cst [1] : vector<16x32xf32> to vector<16xf32>
    %4 = vector.shape_cast %3 : vector<16xf32> to vector<16x1xf32>
    %cst_5 = arith.constant 3.200000e+01 : f32
    %5 = vector.broadcast %cst_5 : f32 to vector<16x1xf32>
    %6 = arith.divf %4, %5 : vector<16x1xf32>
    %7 = vector.broadcast %6 : vector<16x1xf32> to vector<16x32xf32>
    %8 = arith.subf %0, %7 : vector<16x32xf32>
    %9 = arith.mulf %8, %8 : vector<16x32xf32>
    %cst_6 = arith.constant dense<0.000000e+00> : vector<16xf32>
    %10 = vector.multi_reduction <add>, %9, %cst_6 [1] : vector<16x32xf32> to vector<16xf32>
    %11 = vector.shape_cast %10 : vector<16xf32> to vector<16x1xf32>
    %cst_7 = arith.constant 3.200000e+01 : f32
    %12 = vector.broadcast %cst_7 : f32 to vector<16x1xf32>
    %13 = arith.divf %11, %12 : vector<16x1xf32>
    %14 = vector.broadcast %6 : vector<16x1xf32> to vector<16x32xf32>
    %15 = arith.subf %0, %14 : vector<16x32xf32>
    %cst_8 = arith.constant 9.99999996E-13 : f32
    %16 = vector.broadcast %cst_8 : f32 to vector<16x1xf32>
    %17 = arith.addf %13, %16 : vector<16x1xf32>
    %18 = math.rsqrt %17 : vector<16x1xf32>
    %19 = vector.broadcast %18 : vector<16x1xf32> to vector<16x32xf32>
    %20 = arith.mulf %15, %19 : vector<16x32xf32>
    %21 = vector.broadcast %1 : vector<1x32xf32> to vector<16x32xf32>
    %22 = arith.mulf %20, %21 : vector<16x32xf32>
    %23 = vector.broadcast %2 : vector<1x32xf32> to vector<16x32xf32>
    %24 = arith.addf %22, %23 : vector<16x32xf32>
    %c0_9 = arith.constant 0 : index
    %c0_10 = arith.constant 0 : index
    %25 = vector.load %arg4[%c0_9, %c0_10] : memref<32x64xf32, #tpu.memory_space<vmem>>, vector<32x64xf32>
    %cst_11 = arith.constant dense<0.000000e+00> : vector<16x64xf32>
    %26 = tpu.matmul %24, %25, %cst_11 {dimension_numbers = #tpu.dot_dimension_numbers<[1], [0], [0], [1], [0, 0, 1, 1], [], []>} : vector<16x32xf32>, vector<32x64xf32>, vector<16x64xf32> -> vector<16x64xf32>
    %c0_12 = arith.constant 0 : index
    %c0_13 = arith.constant 0 : index
    %27 = vector.load %arg5[%c0_12, %c0_13] : memref<1x64xf32, #tpu.memory_space<vmem>>, vector<1x64xf32>
    %28 = vector.broadcast %27 : vector<1x64xf32> to vector<16x64xf32>
    %29 = arith.addf %26, %28 : vector<16x64xf32>
    %30 = arith.negf %29 : vector<16x64xf32>
    %31 = math.exp %30 : vector<16x64xf32>
    %cst_14 = arith.constant 1.000000e+00 : f32
    %32 = vector.broadcast %cst_14 : f32 to vector<16x64xf32>
    %33 = arith.addf %32, %31 : vector<16x64xf32>
    %34 = arith.divf %32, %33 : vector<16x64xf32>
    %35 = arith.mulf %29, %34 : vector<16x64xf32>
    %c0_15 = arith.constant 0 : index
    %c0_16 = arith.constant 0 : index
    %36 = vector.load %arg6[%c0_15, %c0_16] : memref<64x32xf32, #tpu.memory_space<vmem>>, vector<64x32xf32>
    %cst_17 = arith.constant dense<0.000000e+00> : vector<16x32xf32>
    %37 = tpu.matmul %35, %36, %cst_17 {dimension_numbers = #tpu.dot_dimension_numbers<[1], [0], [0], [1], [0, 0, 1, 1], [], []>} : vector<16x64xf32>, vector<64x32xf32>, vector<16x32xf32> -> vector<16x32xf32>
    %c0_18 = arith.constant 0 : index
    %c0_19 = arith.constant 0 : index
    %38 = vector.load %arg7[%c0_18, %c0_19] : memref<1x32xf32, #tpu.memory_space<vmem>>, vector<1x32xf32>
    %39 = vector.broadcast %38 : vector<1x32xf32> to vector<16x32xf32>
    %40 = arith.addf %37, %39 : vector<16x32xf32>
    %cst_20 = arith.constant 5.000000e-01 : f32
    %41 = vector.broadcast %cst_20 : f32 to vector<16x32xf32>
    %42 = arith.mulf %41, %40 : vector<16x32xf32>
    %43 = arith.addf %42, %0 : vector<16x32xf32>
    %c0_21 = arith.constant 0 : index
    %c0_22 = arith.constant 0 : index
    %44 = vector.load %arg8[%c0_21, %c0_22] : memref<1x32xf32, #tpu.memory_space<vmem>>, vector<1x32xf32>
    %c0_23 = arith.constant 0 : index
    %c0_24 = arith.constant 0 : index
    %45 = vector.load %arg9[%c0_23, %c0_24] : memref<1x32xf32, #tpu.memory_space<vmem>>, vector<1x32xf32>
    %cst_25 = arith.constant dense<0.000000e+00> : vector<16xf32>
    %46 = vector.multi_reduction <add>, %43, %cst_25 [1] : vector<16x32xf32> to vector<16xf32>
    %47 = vector.shape_cast %46 : vector<16xf32> to vector<16x1xf32>
    %cst_26 = arith.constant 3.200000e+01 : f32
    %48 = vector.broadcast %cst_26 : f32 to vector<16x1xf32>
    %49 = arith.divf %47, %48 : vector<16x1xf32>
    %50 = vector.broadcast %49 : vector<16x1xf32> to vector<16x32xf32>
    %51 = arith.subf %43, %50 : vector<16x32xf32>
    %52 = arith.mulf %51, %51 : vector<16x32xf32>
    %cst_27 = arith.constant dense<0.000000e+00> : vector<16xf32>
    %53 = vector.multi_reduction <add>, %52, %cst_27 [1] : vector<16x32xf32> to vector<16xf32>
    %54 = vector.shape_cast %53 : vector<16xf32> to vector<16x1xf32>
    %cst_28 = arith.constant 3.200000e+01 : f32
    %55 = vector.broadcast %cst_28 : f32 to vector<16x1xf32>
    %56 = arith.divf %54, %55 : vector<16x1xf32>
    %57 = vector.broadcast %49 : vector<16x1xf32> to vector<16x32xf32>
    %58 = arith.subf %43, %57 : vector<16x32xf32>
    %cst_29 = arith.constant 9.99999996E-13 : f32
    %59 = vector.broadcast %cst_29 : f32 to vector<16x1xf32>
    %60 = arith.addf %56, %59 : vector<16x1xf32>
    %61 = math.rsqrt %60 : vector<16x1xf32>
    %62 = vector.broadcast %61 : vector<16x1xf32> to vector<16x32xf32>
    %63 = arith.mulf %58, %62 : vector<16x32xf32>
    %64 = vector.broadcast %44 : vector<1x32xf32> to vector<16x32xf32>
    %65 = arith.mulf %63, %64 : vector<16x32xf32>
    %66 = vector.broadcast %45 : vector<1x32xf32> to vector<16x32xf32>
    %67 = arith.addf %65, %66 : vector<16x32xf32>
    %c0_30 = arith.constant 0 : index
    %c0_31 = arith.constant 0 : index
    %68 = vector.load %arg10[%c0_30, %c0_31] : memref<16x32xf32, #tpu.memory_space<vmem>>, vector<16x32xf32>
    tpu.vector_store %arg10[%c0_30, %c0_31], %67 {strides = array<i32>} : memref<16x32xf32, #tpu.memory_space<vmem>>, vector<16x32xf32>,
    return
  }
  func.func @transform_0(%arg0: i32) -> (i32, i32) {
    %c0_i32 = arith.constant 0 : i32
    %c0_i32_0 = arith.constant 0 : i32
    return %arg0, %c0_i32 : i32, i32
  }
  func.func @transform_1(%arg0: i32) -> (i32, i32) {
    %c0_i32 = arith.constant 0 : i32
    %c0_i32_0 = arith.constant 0 : i32
    %c0_i32_1 = arith.constant 0 : i32
    return %c0_i32, %c0_i32_0 : i32, i32
  }
  func.func @transform_2(%arg0: i32) -> (i32, i32) {
    %c0_i32 = arith.constant 0 : i32
    %c0_i32_0 = arith.constant 0 : i32
    %c0_i32_1 = arith.constant 0 : i32
    return %c0_i32, %c0_i32_0 : i32, i32
  }
  func.func @transform_3(%arg0: i32) -> (i32, i32) {
    %c0_i32 = arith.constant 0 : i32
    %c0_i32_0 = arith.constant 0 : i32
    %c0_i32_1 = arith.constant 0 : i32
    return %c0_i32, %c0_i32_0 : i32, i32
  }
  func.func @transform_4(%arg0: i32) -> (i32, i32) {
    %c0_i32 = arith.constant 0 : i32
    %c0_i32_0 = arith.constant 0 : i32
    %c0_i32_1 = arith.constant 0 : i32
    return %c0_i32, %c0_i32_0 : i32, i32
  }
  func.func @transform_5(%arg0: i32) -> (i32, i32) {
    %c0_i32 = arith.constant 0 : i32
    %c0_i32_0 = arith.constant 0 : i32
    %c0_i32_1 = arith.constant 0 : i32
    return %c0_i32, %c0_i32_0 : i32, i32
  }
  func.func @transform_6(%arg0: i32) -> (i32, i32) {
    %c0_i32 = arith.constant 0 : i32
    %c0_i32_0 = arith.constant 0 : i32
    %c0_i32_1 = arith.constant 0 : i32
    return %c0_i32, %c0_i32_0 : i32, i32
  }
  func.func @transform_7(%arg0: i32) -> (i32, i32) {
    %c0_i32 = arith.constant 0 : i32
    %c0_i32_0 = arith.constant 0 : i32
    %c0_i32_1 = arith.constant 0 : i32
    return %c0_i32, %c0_i32_0 : i32, i32
  }
  func.func @transform_8(%arg0: i32) -> (i32, i32) {
    %c0_i32 = arith.constant 0 : i32
    %c0_i32_0 = arith.constant 0 : i32
    %c0_i32_1 = arith.constant 0 : i32
    return %c0_i32, %c0_i32_0 : i32, i32
  }
  func.func @transform_9(%arg0: i32) -> (i32, i32) {
    %c0_i32 = arith.constant 0 : i32
    %c0_i32_0 = arith.constant 0 : i32
    return %arg0, %c0_i32 : i32, i32
  }
}

</mosaic_0001>

<bundles_post_ra>
// kernel: conformer_block_forward.6
= control target key start
LH: loop header
LB: loop body
LE: loop exit
PB: predicated region body
PF: predicated region fallthrough
CT: control target
= control target key end

     0   :  { %v132_v0 = vmov 0.0|0.0   ;;  %vm133_vm0 = vmmov 0   ;;  %v134_v4 = vmov 0.0   ;;  %vm26_vm1 = vcmask 261120   ;;  %s176_s1 = inlined_call_operand.vmem [shape: f32[32,32], index: 1, kind: input, shape index: {}]   ;;  %s177_s0 = inlined_call_operand.vmem [shape: f32[8,32], index: 0, kind: input, shape index: {}]   ;;  %s178_s2 = inlined_call_operand.vmem [shape: f32[1,32], index: 2, kind: input, shape index: {}]   ;;  %s179_s3 = inlined_call_operand.vmem [shape: f32[8,32], index: 3, kind: output, shape index: {}]  }
   0x1   :  { %123 = vmatprep.subr.bf16.mxu0 %v132_v0  ;;  %v15_v1 = vld [vmem:[%s176_s1] sm:$0xff]  ;;  %v16_v2 = vld [vmem:[%s176_s1 + $0x8] sm:$0xff]  ;;  %v17_v3 = vld [vmem:[%s176_s1 + $0x10] sm:$0xff]  ;;  %120 = vmatprep.mubr.msk.f32.mxu0 %vm133_vm0, %v134_v4 }
   0x2   :  { %v124_v5 = vpack.c.bf16 %v16_v2, %v15_v1  ;;  %v18_v6 = vld [vmem:[%s176_s1 + $0x18] sm:$0xff]  ;;  %v14_v8 = vld [vmem:[%s177_s0] sm:$0xff] }
   0x3   :  { %v127_v7 = vpack.c.bf16 %v18_v6, %v17_v3  ;;  %v105_v9 = vld [vmem:[%s178_s2] ss:$0 sm:$0xff] }
   0x4   :  { %125 = vmatpush3.bf16.msra.mxu0 %v124_v5 }
   0x5   :  { %126 = vmatprep.subr.bf16.mxu0 %v132_v0 }
   0x8   :  { %128 = vmatpush3.bf16.msra.mxu0 %v127_v7 }
   0xb   :  { %121 = vmatmul.mubr.msk.f32.vlgmr.msra.gmra.mrb[0].mxu0 %vm26_vm1, %v14_v8 }
  0xde   :  { %v96_v10 = vpop.f32.mrb[0].mxu0 }
  0xdf   :  { %v97_v11 = vadd.f32 %v105_v9, %v96_v10  ;;  %v122_v12 = vpop.f32.mrb[1].mxu0 }
  0xe1   :  { %100 = vst.msk [vmem:[%s179_s3] sm:$0xff] %vm26_vm1, %v97_v11 }

// kernel: conformer_block_forward.5
= control target key start
LH: loop header
LB: loop body
LE: loop exit
PB: predicated region body
PF: predicated region fallthrough
CT: control target
= control target key end

     0   :  { %vm36_vm0 = vcmask 261120   ;;  %vm201_vm1 = vcmask 523264   ;;  %s513_s0 = inlined_call_operand.vmem [shape: f32[16,32], index: 0, kind: input, shape index: {}]   ;;  %s514_s7 = inlined_call_operand.vmem [shape: f32[1,32], index: 7, kind: input, shape index: {}]   ;;  %s515_s8 = inlined_call_operand.vmem [shape: f32[1,32], index: 8, kind: input, shape index: {}]   ;;  %s516_s3 = inlined_call_operand.vmem [shape: f32[32,64], index: 3, kind: input, shape index: {}]   ;;  %s517_s1 = inlined_call_operand.vmem [shape: f32[1,32], index: 1, kind: input, shape index: {}]   ;;  %s518_s2 = inlined_call_operand.vmem [shape: f32[1,32], index: 2, kind: input, shape index: {}]   ;;  %s519_s5 = inlined_call_operand.vmem [shape: f32[64,32], index: 5, kind: input, shape index: {}]   ;;  %s520_s4 = inlined_call_operand.vmem [shape: f32[1,64], index: 4, kind: input, shape index: {}]   ;;  %s521_s6 = inlined_call_operand.vmem [shape: f32[1,32], index: 6, kind: input, shape index: {}]   ;;  %s522_s9 = inlined_call_operand.vmem [shape: f32[16,32], index: 9, kind: output, shape index: {}]  }
   0x1   :  { %v438_v0 = vld [vmem:[%s513_s0] sm:$0xff]  ;;  %v443_v1 = vld [vmem:[%s513_s0 + $0x8] sm:$0xff]  ;;  %v82_v16 = vld [vmem:[%s516_s3 + $0x10] sm:$0xff] }
   0x2   :  { %v37_v2 = vsel %vm36_vm0, %v438_v0, 0.0  ;;  %v40_v3 = vsel %vm36_vm0, %v443_v1, 0.0  ;;  %v80_v14 = vld [vmem:[%s516_s3] sm:$0xff]  ;;  %v81_v15 = vld [vmem:[%s516_s3 + $0x8] sm:$0xff]  ;;  %v83_v18 = vld [vmem:[%s516_s3 + $0x18] sm:$0xff] }
   0x3   :  { %38 = vadd.xlane.f32.xlu0 %v37_v2  ;;  %v349_v17 = vpack.c.bf16 %v81_v15, %v80_v14  ;;  %v353_v19 = vpack.c.bf16 %v83_v18, %v82_v16  ;;  %v293_v27 = vld [vmem:[%s517_s1] ss:$0 sm:$0xff]  ;;  %v187_v37 = vld [vmem:[%s519_s5 + $0x8] sm:$0xff]  ;;  %v188_v39 = vld [vmem:[%s519_s5 + $0x10] sm:$0xff] }
   0x4   :  { %v294_v29 = vld [vmem:[%s518_s2] ss:$0 sm:$0xff]  ;;  %v189_v40 = vld [vmem:[%s519_s5 + $0x18] sm:$0xff]  ;;  %v191_v43 = vld [vmem:[%s519_s5 + $0x28] sm:$0xff] }
   0x5   :  { %350 = vmatprep.subr.bf16.mxu0 %v349_v17  ;;  %v186_v36 = vld [vmem:[%s519_s5] sm:$0xff]  ;;  %v361_v41 = vpack.c.bf16 %v189_v40, %v188_v39  ;;  %v192_v45 = vld [vmem:[%s519_s5 + $0x30] sm:$0xff]  ;;  %v193_v46 = vld [vmem:[%s519_s5 + $0x38] sm:$0xff] }
   0x6   :  { %352 = vmatpush3.bf16.msra.mxu0 %v349_v17  ;;  %v357_v38 = vpack.c.bf16 %v187_v37, %v186_v36  ;;  %v190_v42 = vld [vmem:[%s519_s5 + $0x20] sm:$0xff]  ;;  %v369_v47 = vpack.c.bf16 %v193_v46, %v192_v45 }
   0x7   :  { %41 = vadd.xlane.f32.xlu0 %v40_v3  ;;  %354 = vmatprep.subr.bf16.mxu0 %v353_v19  ;;  %v365_v44 = vpack.c.bf16 %v191_v43, %v190_v42  ;;  %v295_v48 = vld [vmem:[%s520_s4] ss:$0 sm:$0xff] }
   0x8   :  { %358 = vmatprep.subr.bf16.mxu1 %v357_v38  ;;  %v300_v63 = vld [vmem:[%s521_s6] ss:$0 sm:$0xff] }
   0x9   :  { %360 = vmatpush3.bf16.msra.mxu1 %v357_v38 }
   0xa   :  { %356 = vmatpush3.bf16.msra.mxu0 %v353_v19  ;;  %362 = vmatprep.subr.bf16.mxu1 %v361_v41 }
   0xd   :  { %364 = vmatpush3.bf16.msra.mxu1 %v361_v41 }
   0xe   :  { %366 = vmatprep.subr.bf16.mxu1 %v365_v44 }
  0x11   :  { %368 = vmatpush3.bf16.msra.mxu1 %v365_v44 }
  0x12   :  { %370 = vmatprep.subr.bf16.mxu1 %v369_v47 }
  0x15   :  { %372 = vmatpush3.bf16.msra.mxu1 %v369_v47 }
  0x90   :  { %v39_v4 = vpop.xlane.xlu0 %38 }
  0x91   :  { %v44_v5 = vmul.f32 0.03125, %v39_v4 }
  0x93   :  { %v46_v6 = vsub.f32 %v438_v0, %v44_v5 }
  0x94   :  { %v42_v7 = vpop.xlane.xlu0 %41 }
  0x95   :  { %v45_v8 = vmul.f32 0.03125, %v42_v7  ;;  %v48_v9 = vmul.f32 %v46_v6, %v46_v6 }
  0x97   :  { %v47_v10 = vsub.f32 %v443_v1, %v45_v8  ;;  %v50_v11 = vsel %vm36_vm0, %v48_v9, 0.0 }
  0x98   :  { %51 = vadd.xlane.f32.xlu1 %v50_v11 }
  0x99   :  { %v49_v12 = vmul.f32 %v47_v10, %v47_v10 }
  0x9b   :  { %v53_v13 = vsel %vm36_vm0, %v49_v12, 0.0 }
  0x9c   :  { %54 = vadd.xlane.f32.xlu1 %v53_v13 }
 0x125   :  { %v52_v20 = vpop.xlane.xlu1 %51 }
 0x126   :  { %v56_v21 = vmul.f32 0.03125, %v52_v20 }
 0x128   :  { %v58_v22 = vadd.f32 1e-12, %v56_v21 }
 0x129   :  { %v55_v23 = vpop.xlane.xlu1 %54 }
 0x12a   :  { %373 = vrsqrt.f32 %v58_v22  ;;  %v57_v24 = vmul.f32 0.03125, %v55_v23 }
 0x12c   :  { %v59_v25 = vadd.f32 1e-12, %v57_v24 }
 0x12e   :  { %375 = vrsqrt.f32 %v59_v25 }
 0x134   :  { %v374_v26 = vpop.eup %373 }
 0x135   :  { %v62_v28 = vmul.f32 %v374_v26, %v46_v6 }
 0x137   :  { %v70_v30 = vmul.f32 %v293_v27, %v62_v28 }
 0x138   :  { %v376_v31 = vpop.eup %375 }
 0x139   :  { %v63_v32 = vmul.f32 %v376_v31, %v47_v10  ;;  %v78_v33 = vadd.f32 %v294_v29, %v70_v30 }
 0x13b   :  { %v71_v34 = vmul.f32 %v293_v27, %v63_v32  ;;  %327 = vmatprep.mubr.msk.f32.mxu0 %vm36_vm0, %v78_v33 }
 0x13d   :  { %v79_v35 = vadd.f32 %v294_v29, %v71_v34 }
 0x13f   :  { %328 = vmatmul.mubr.msk.f32.vlgmr.msra.gmra.mrb[0].mxu0 %vm36_vm0, %v79_v35 }
 0x212   :  { %v329_v49 = vpop.f32.mrb[0].mxu0 }
 0x213   :  { %v169_v50 = vadd.f32 %v329_v49, %v295_v48  ;;  %v163_v51 = vpop.f32.mrb[1].mxu0 }
 0x214   :  { %v164_v52 = vadd.f32 %v295_v48, %v163_v51 }
 0x215   :  { %v299_v53 = vmul.f32 -1.442695, %v169_v50 }
 0x216   :  { %v298_v54 = vmul.f32 -1.442695, %v164_v52 }
 0x217   :  { %377 = vpow2.f32 %v299_v53 }
 0x218   :  { %379 = vpow2.f32 %v298_v54 }
 0x221   :  { %v378_v55 = vpop.eup %377 }
 0x222   :  { %v380_v56 = vpop.eup %379  ;;  %v179_v57 = vadd.f32 1.0, %v378_v55 }
 0x223   :  { %v178_v58 = vadd.f32 1.0, %v380_v56 }
 0x224   :  { %381 = vrcp.f32 %v179_v57 }
 0x225   :  { %383 = vrcp.f32 %v178_v58 }
 0x22e   :  { %v382_v59 = vpop.eup %381 }
 0x22f   :  { %v384_v60 = vpop.eup %383  ;;  %v185_v62 = vmul.f32 %v382_v59, %v169_v50 }
 0x230   :  { %v184_v61 = vmul.f32 %v384_v60, %v164_v52 }
 0x232   :  { %346 = vmatprep.mubr.msk.f32.mxu1 %vm201_vm1, %v184_v61 }
 0x233   :  { %347 = vmatmul.mubr.msk.f32.vlgmr.msra.gmra.mrb[0].mxu1 %vm201_vm1, %v185_v62 }
 0x306   :  { %v348_v2 = vpop.f32.mrb[0].mxu1 }
 0x307   :  { %v280_v3 = vadd.f32 %v348_v2, %v300_v63  ;;  %v274_v4 = vpop.f32.mrb[1].mxu1 }
 0x308   :  { %v275_v5 = vadd.f32 %v300_v63, %v274_v4 }
 0x309   :  { %v284_v6 = vmul.f32 0.5, %v280_v3 }
 0x30a   :  { %v283_v7 = vmul.f32 0.5, %v275_v5 }
 0x30b   :  { %v286_v8 = vadd.f32 %v284_v6, %v443_v1 }
 0x30c   :  { %v285_v9 = vadd.f32 %v283_v7, %v438_v0 }
 0x30d   :  { %288 = vst.msk [vmem:[%s522_s9 + $0x8] sm:$0xff] %vm36_vm0, %v286_v8 }
 0x30e   :  { %287 = vst.msk [vmem:[%s522_s9] sm:$0xff] %vm36_vm0, %v285_v9 }

// kernel: conformer_block_forward.8
= control target key start
LH: loop header
LB: loop body
LE: loop exit
PB: predicated region body
PF: predicated region fallthrough
CT: control target
= control target key end

     0   :  { %s893_s17 = smov 0   ;;  %s981_s0 = inlined_call_operand.vmem [shape: f32[2,8,32], index: 0, kind: input, shape index: {}]   ;;  %s982_s1 = inlined_call_operand.vmem [shape: f32[1,32], index: 1, kind: input, shape index: {}]   ;;  %s983_s2 = inlined_call_operand.vmem [shape: f32[1,32], index: 2, kind: input, shape index: {}]   ;;  %s984_s3 = inlined_call_operand.vmem [shape: f32[32,64], index: 3, kind: input, shape index: {}]   ;;  %s985_s4 = inlined_call_operand.vmem [shape: f32[1,64], index: 4, kind: input, shape index: {}]   ;;  %s986_s5 = inlined_call_operand.vmem [shape: f32[3,32], index: 5, kind: input, shape index: {}]   ;;  %s987_s6 = inlined_call_operand.vmem [shape: f32[1,32], index: 6, kind: input, shape index: {}]   ;;  %s988_s7 = inlined_call_operand.vmem [shape: f32[1,32], index: 7, kind: input, shape index: {}]   ;;  %s989_s8 = inlined_call_operand.vmem [shape: f32[1,32], index: 8, kind: input, shape index: {}]   ;;  %s990_s9 = inlined_call_operand.vmem [shape: f32[32,32], index: 9, kind: input, shape index: {}]   ;;  %s991_s10 = inlined_call_operand.vmem [shape: f32[1,32], index: 10, kind: input, shape index: {}]   ;;  %s992_s11 = inlined_call_operand.vmem [shape: f32[2,8,32], index: 11, kind: output, shape index: {}]  }
   0x1 LB: > { %s733_s18 = sadd.s32 4294967295, %s827_s17   ;;  %p737_p0 = scmp.ge.s32.totalorder %s827_s17, 1  ;;  %s827_s17 = sphi %s893_s17, %s21_s17  }
   0x2   : > { %p336_p1 = scmp.lt.s32.totalorder %s827_s17, 3 }
   0x4   : > { %p337_p2 = pnand %p737_p0, %p336_p1 }
   0x5   : > { %p374_p3 = scmp.lt.s32.totalorder (!%p337_p2), %s733_s18, 1  ;;  %vm385_vm0 = vcmask (!%p337_p2), 261120   ;;  %v414_v7 = vld [vmem:[%s984_s3] sm:$0xff] (!%p337_p2)  ;;  %v415_v8 = vld [vmem:[%s984_s3 + $0x8] sm:$0xff] (!%p337_p2)  ;;  %v416_v9 = vld [vmem:[%s984_s3 + $0x10] sm:$0xff] (!%p337_p2)  ;;  %v829_v10 = vmov (!%p337_p2), 0.0|0.0   ;;  %v516_v32 = vlaneseq (!%p337_p2) }
   0x6   : > { %340 = sbr.rel (%p337_p2) target bundleno = 1259 (0x4eb), region = 64  ;;  %785 = vmatprep.subr.bf16.mxu0 (!%p337_p2), %v829_v10  ;;  %v786_v11 = vpack.c.bf16 (!%p337_p2), %v415_v8, %v414_v7  ;;  %v417_v12 = vld [vmem:[%s984_s3 + $0x18] sm:$0xff] (!%p337_p2)  ;;  %vm830_vm1 = vmmov (!%p337_p2), 0   ;;  %v831_v13 = vmov (!%p337_p2), 0.0   ;;  %791 = vmatprep.subr.bf16.mxu1 (!%p337_p2), %v829_v10  ;;  %v740_v19 = vld [vmem:[%s982_s1] ss:$0 sm:$0xff] (!%p337_p2) }
   0x7   : > { %771 = vmatprep.mubr.msk.f32.mxu0 (!%p337_p2), %vm830_vm1, %v831_v13  ;;  %782 = vmatprep.mubr.msk.f32.mxu1 (!%p337_p2), %vm830_vm1, %v831_v13  ;;  %v789_v14 = vpack.c.bf16 (!%p337_p2), %v417_v12, %v416_v9  ;;  %v741_v21 = vld [vmem:[%s983_s2] ss:$0 sm:$0xff] (!%p337_p2)  ;;  %s832_s21 = smov (!%p337_p2), 96   ;;  %v517_v33 = vshrl.u32 (!%p337_p2), %v516_v32, 7  ;;  %vm512_vm2 = vcmask (!%p337_p2), 1040384   ;;  %vm530_vm3 = vcmask (!%p337_p2), 1046528  }
   0x8   : > { %787 = vmatpush3.bf16.msra.mxu0 (!%p337_p2), %v786_v11  ;;  %v742_v24 = vld [vmem:[%s985_s4] ss:$0 sm:$0xff] (!%p337_p2)  ;;  %vm544_vm4 = vcmask (!%p337_p2), 1045504   ;;  %v597_v8 = vld [vmem:[%s990_s9 + $0x18] sm:$0xff] (!%p337_p2) }
   0x9   : > { %788 = vmatprep.subr.bf16.mxu0 (!%p337_p2), %v829_v10  ;;  %v524_v34 = vsub.s32 (!%p337_p2), 1, %v517_v33  ;;  %v538_v35 = vsub.s32 (!%p337_p2), 2, %v517_v33  ;;  %v515_v36 = vld [vmem:[%s986_s5] sm:$0x7] (!%p337_p2)  ;;  %v518_v38 = vsub.s32 (!%p337_p2), 0, %v517_v33 }
   0xa   : > { %v745_v58 = vld [vmem:[%s987_s6] ss:$0 sm:$0xff] (!%p337_p2) }
   0xb   : > { %v525_v40 = vrot.slane (!%p337_p2), %v515_v36, %v524_v34  ;;  %v539_v41 = vrot.slane (!%p337_p2), %v515_v36, %v538_v35  ;;  %v519_v43 = vrot.slane (!%p337_p2), %v515_v36, %v518_v38 }
   0xc   : > { %790 = vmatpush3.bf16.msra.mxu0 (!%p337_p2), %v789_v14 }
   0xd   : > { %s994_s18 = smov (!%p374_p3, %s733_s18), 1 }
   0xe   : > { %s738_s19 = sshll.u32 %s994_s18, 3 }
   0xf   : > { %s377_s22 = scalar_lea.vmem %s981_s0, %s738_s19  ;;  %s381_s26 = scalar_lea.vmem %s992_s11, %s738_s19 }
  0x10   : > { %v909_v0 = vld [vmem:[%s377_s22] sm:$0xff] }
  0x11   : > { %v386_v1 = vsel %vm385_vm0, %v909_v0, 0.0 }
  0x12   : > { %387 = vadd.xlane.f32.xlu0 %v386_v1 }
  0x9f   : > { %v388_v2 = vpop.xlane.xlu0 %387 }
  0xa0   : > { %v390_v3 = vmul.f32 0.03125, %v388_v2 }
  0xa2   : > { %v391_v4 = vsub.f32 %v909_v0, %v390_v3 }
  0xa4   : > { %v392_v5 = vmul.f32 %v391_v4, %v391_v4 }
  0xa6   : > { %v393_v6 = vsel %vm385_vm0, %v392_v5, 0.0  ;;  %v595_v5 = vld [vmem:[%s990_s9 + $0x8] sm:$0xff] }
  0xa7   : > { %394 = vadd.xlane.f32.xlu0 %v393_v6  ;;  %v596_v6 = vld [vmem:[%s990_s9 + $0x10] sm:$0xff] }
  0xa8   : > { %v795_v9 = vpack.c.bf16 %v597_v8, %v596_v6 }
 0x134   : > { %v395_v15 = vpop.xlane.xlu0 %394 }
 0x135   : > { %v396_v16 = vmul.f32 0.03125, %v395_v15  ;;  %v746_v15 = vld [vmem:[%s988_s7] ss:$0 sm:$0xff] }
 0x137   : > { %v397_v17 = vadd.f32 1e-12, %v396_v16 }
 0x139   : > { %809 = vrsqrt.f32 %v397_v17  ;;  %v747_v17 = vld [vmem:[%s989_s8] ss:$0 sm:$0xff] }
 0x143   : > { %v810_v18 = vpop.eup %809 }
 0x144   : > { %v399_v20 = vmul.f32 %v810_v18, %v391_v4  ;;  %v594_v4 = vld [vmem:[%s990_s9] sm:$0xff] }
 0x145   : > { %v792_v7 = vpack.c.bf16 %v595_v5, %v594_v4 }
 0x146   : > { %v406_v22 = vmul.f32 %v740_v19, %v399_v20 }
 0x147   : > { %793 = vmatpush3.bf16.msra.mxu1 %v792_v7 }
 0x148   : > { %v413_v23 = vadd.f32 %v741_v21, %v406_v22  ;;  %794 = vmatprep.subr.bf16.mxu1 %v829_v10 }
 0x14a   : > { %772 = vmatmul.mubr.msk.f32.vlgmr.msra.gmra.mrb[0].mxu0 %vm385_vm0, %v413_v23 }
 0x14b   : > { %796 = vmatpush3.bf16.msra.mxu1 %v795_v9 }
 0x21d   : > { %v494_v25 = vpop.f32.mrb[0].mxu0 }
 0x21e   : > { %v495_v26 = vadd.f32 %v742_v24, %v494_v25  ;;  %v773_v27 = vpop.f32.mrb[1].mxu0  ;;  %v749_v24 = vld [vmem:[%s991_s10] ss:$0 sm:$0xff] }
 0x220   : > { %v744_v28 = vmul.f32 -1.442695, %v495_v26 }
 0x222   : > { %811 = vpow2.f32 %v744_v28 }
 0x22c   : > { %v812_v29 = vpop.eup %811 }
 0x22d   : > { %v501_v30 = vadd.f32 1.0, %v812_v29 }
 0x22f   : > { %813 = vrcp.f32 %v501_v30 }
 0x239   : > { %v814_v31 = vpop.eup %813 }
 0x23a   : > { %505 = vrot.lane.b32.xlu1 %v814_v31, %s832_s21 }
 0x2ac   : > { %v506_v37 = vpop.permute.xlu1 %505 }
 0x2ad   : > { %v508_v39 = vmul.f32 %v506_v37, %v495_v26 }
 0x2af   : > { %v510_v42 = vrot.slane %v508_v39, 7 }
 0x2b1   : > { %v513_v44 = vsel %vm512_vm2, 0.0, %v510_v42  ;;  %v514_v45 = vsel %vm512_vm2, %v510_v42, 0.0 }
 0x2b2   : > { %v526_v46 = vmul.f32 %v525_v40, %v513_v44  ;;  %v527_v47 = vmul.f32 %v525_v40, %v514_v45  ;;  %v540_v48 = vmul.f32 %v539_v41, %v513_v44  ;;  %v541_v49 = vmul.f32 %v539_v41, %v514_v45 }
 0x2b3   : > { %v520_v53 = vmul.f32 %v519_v43, %v513_v44 }
 0x2b4   : > { %v531_v50 = vrot.slane %v526_v46, 1  ;;  %v532_v51 = vrot.slane %v527_v47, 1  ;;  %v545_v52 = vrot.slane %v540_v48, 2  ;;  %v546_v54 = vrot.slane %v541_v49, 2 }
 0x2b6   : > { %v533_v55 = vsel %vm530_vm3, %v531_v50, %v532_v51  ;;  %v547_v57 = vsel %vm544_vm4, %v545_v52, %v546_v54 }
 0x2b7   : > { %v535_v56 = vadd.f32 %v533_v55, %v520_v53 }
 0x2b9   : > { %v549_v59 = vadd.f32 %v547_v57, %v535_v56 }
 0x2bb   : > { %v557_v60 = vadd.f32 %v745_v58, %v549_v59 }
 0x2bd   : > { %v560_v61 = vsel %vm385_vm0, %v557_v60, 0.0 }
 0x2be   : > { %561 = vadd.xlane.f32.xlu1 %v560_v61 }
 0x34b   : > { %v562_v62 = vpop.xlane.xlu1 %561 }
 0x34c   : > { %v563_v63 = vmul.f32 0.03125, %v562_v62 }
 0x34e   : > { %v564_v1 = vsub.f32 %v557_v60, %v563_v63 }
 0x350   : > { %v565_v2 = vmul.f32 %v564_v1, %v564_v1 }
 0x352   : > { %v566_v3 = vsel %vm385_vm0, %v565_v2, 0.0 }
 0x353   : > { %567 = vadd.xlane.f32.xlu0 %v566_v3 }
 0x3e0   : > { %v568_v11 = vpop.xlane.xlu0 %567 }
 0x3e1   : > { %v569_v12 = vmul.f32 0.03125, %v568_v11 }
 0x3e3   : > { %v570_v13 = vadd.f32 1e-05, %v569_v12 }
 0x3e5   : > { %815 = vrsqrt.f32 %v570_v13 }
 0x3ef   : > { %v816_v14 = vpop.eup %815 }
 0x3f0   : > { %v572_v16 = vmul.f32 %v816_v14, %v564_v1 }
 0x3f2   : > { %v579_v18 = vmul.f32 %v746_v15, %v572_v16 }
 0x3f4   : > { %v586_v19 = vadd.f32 %v747_v17, %v579_v18 }
 0x3f6   : > { %v748_v20 = vmul.f32 -1.442695, %v586_v19 }
 0x3f8   : > { %817 = vpow2.f32 %v748_v20 }
 0x402   : > { %v818_v10 = vpop.eup %817 }
 0x403   : > { %v590_v21 = vadd.f32 1.0, %v818_v10 }
 0x405   : > { %819 = vrcp.f32 %v590_v21 }
 0x40f   : > { %v820_v22 = vpop.eup %819 }
 0x410   : > { %v593_v23 = vmul.f32 %v820_v22, %v586_v19 }
 0x412   : > { %783 = vmatmul.mubr.msk.f32.vlgmr.msra.gmra.mrb[0].mxu1 %vm385_vm0, %v593_v23 }
 0x4e5   : > { %v674_v25 = vpop.f32.mrb[0].mxu1 }
 0x4e6   : > { %v675_v26 = vadd.f32 %v749_v24, %v674_v25  ;;  %v784_v27 = vpop.f32.mrb[1].mxu1 }
 0x4e8   : > { %v678_v28 = vadd.f32 %v675_v26, %v909_v0 }
 0x4ea   : > { %679 = vst.msk [vmem:[%s381_s26] sm:$0xff] %vm385_vm0, %v678_v28 }
 0x4eb PF: > { %s21_s17 = sadd.s32 1, %s827_s17  }
 0x4ec   : > { %p18_p4 = scmp.ge.s32.totalorder %s21_s17, 4  }
 0x4ee   :  { %20 = sbr.rel (!%p18_p4) target bundleno = 1 (0x1), region = 94 }

// kernel: conformer_block_forward.7
= control target key start
LH: loop header
LB: loop body
LE: loop exit
PB: predicated region body
PF: predicated region fallthrough
CT: control target
= control target key end

     0   :  { %s1980_s27 = smov 0   ;;  %s2259_s0 = inlined_call_operand.vmem [shape: f32[2,8,32], index: 0, kind: input, shape index: {}]   ;;  %s2260_s1 = inlined_call_operand.vmem [shape: f32[1,32], index: 1, kind: input, shape index: {}]   ;;  %s2261_s2 = inlined_call_operand.vmem [shape: f32[1,32], index: 2, kind: input, shape index: {}]   ;;  %s2262_s3 = inlined_call_operand.vmem [shape: f32[32,96], index: 3, kind: input, shape index: {}]   ;;  %s2263_s4 = inlined_call_operand.vmem [shape: f32[1,96], index: 4, kind: input, shape index: {}]   ;;  %s2264_s5 = inlined_call_operand.vmem [shape: f32[8,32], index: 5, kind: input, shape index: {}]   ;;  %s2265_s6 = inlined_call_operand.vmem [shape: f32[32,32], index: 6, kind: input, shape index: {}]   ;;  %s2266_s7 = inlined_call_operand.vmem [shape: f32[1,32], index: 7, kind: input, shape index: {}]   ;;  %s2267_s8 = inlined_call_operand.vmem [shape: f32[2,8,32], index: 8, kind: output, shape index: {}]  }
   0x1 LB: > { %s1692_s28 = sadd.s32 4294967295, %s1910_s27   ;;  %p1696_p0 = scmp.ge.s32.totalorder %s1910_s27, 1  ;;  %s1910_s27 = sphi %s1980_s27, %s18_s27  }
   0x2   : > { %p261_p1 = scmp.lt.s32.totalorder %s1910_s27, 3 }
   0x4   : > { %p262_p2 = pnand %p1696_p0, %p261_p1 }
   0x5   : > { %p293_p3 = scmp.lt.s32.totalorder (!%p262_p2), %s1692_s28, 1  ;;  %vm304_vm0 = vcmask (!%p262_p2), 261120   ;;  %v333_v7 = vld [vmem:[%s2262_s3] sm:$0xff] (!%p262_p2)  ;;  %v334_v8 = vld [vmem:[%s2262_s3 + $0x8] sm:$0xff] (!%p262_p2)  ;;  %v335_v9 = vld [vmem:[%s2262_s3 + $0x10] sm:$0xff] (!%p262_p2)  ;;  %v1912_v10 = vmov (!%p262_p2), 0.0|0.0   ;;  %v418_v32 = vlaneseq (!%p262_p2) }
   0x6   : > { %265 = sbr.rel (%p262_p2) target bundleno = 3997 (0xf9d), region = 52  ;;  %1843 = vmatprep.subr.bf16.mxu0 (!%p262_p2), %v1912_v10  ;;  %v1844_v11 = vpack.c.bf16 (!%p262_p2), %v334_v8, %v333_v7  ;;  %v336_v12 = vld [vmem:[%s2262_s3 + $0x18] sm:$0xff] (!%p262_p2)  ;;  %vm1913_vm1 = vmmov (!%p262_p2), 0   ;;  %v1914_v13 = vmov (!%p262_p2), 0.0   ;;  %v1699_v19 = vld [vmem:[%s2260_s1] ss:$0 sm:$0xff] (!%p262_p2) }
   0x7   : > { %1769 = vmatprep.mubr.msk.f32.mxu0 (!%p262_p2), %vm1913_vm1, %v1914_v13  ;;  %1772 = vmatprep.subr.mxu1 (!%p262_p2), %v1914_v13  ;;  %v1847_v14 = vpack.c.bf16 (!%p262_p2), %v336_v12, %v335_v9  ;;  %v1700_v21 = vld [vmem:[%s2261_s2] ss:$0 sm:$0xff] (!%p262_p2)  ;;  %vm435_vm2 = vcmask (!%p262_p2), 64512   ;;  %s1915_s30 = smov (!%p262_p2), 96   ;;  %s1916_s9 = smov (!%p262_p2), 1   ;;  %v2057_v33 = vshrl.u32 (!%p262_p2), %v418_v32, 7 }
   0x8   : > { %1774 = vmatprep.mubr.msk.f32.mxu1 (!%p262_p2), %vm1913_vm1, %v1914_v13  ;;  %1845 = vmatpush3.bf16.msra.mxu0 (!%p262_p2), %v1844_v11  ;;  %v2034_v24 = vld [vmem:[%s2264_s5] sm:$0xff] (!%p262_p2)  ;;  %vm519_vm3 = vcmask (!%p262_p2), 7168   ;;  %s1918_s11 = smov (!%p262_p2), 122   ;;  %s1919_s12 = smov (!%p262_p2), 2   ;;  %vm531_vm5 = vcmask (!%p262_p2), 15360   ;;  %vm544_vm7 = vcmask (!%p262_p2), 31744  }
   0x9   : > { %1846 = vmatprep.subr.bf16.mxu0 (!%p262_p2), %v1912_v10  ;;  %1773 = vmatpush3.xpose.msk.msra.mxu1 (!%p262_p2), %vm435_vm2, %v2034_v24  ;;  %v1701_v25 = vld [vmem:[%s2263_s4] ss:$0 sm:$0xff] (!%p262_p2)  ;;  %v2060_v34 = vadd.s32 (!%p262_p2), 1, %v2057_v33  ;;  %s1920_s13 = smov (!%p262_p2), 124   ;;  %s1921_s14 = smov (!%p262_p2), 4   ;;  %v2082_v53 = vand.u32 (!%p262_p2), 127, %v418_v32 }
   0xa   : > { %1777 = vmatprep.subr.mxu1 (!%p262_p2), %v1914_v13  ;;  %s1922_s15 = smov (!%p262_p2), 64   ;;  %s1923_s16 = smov (!%p262_p2), 120   ;;  %vm1549_vm11 = vcmask (!%p262_p2), 130048   ;;  %vm1551_vm12 = vcmask (!%p262_p2), 195584  }
   0xb   : > { %v427_v35 = vand.u32 (!%p262_p2), 7, %v2060_v34  ;;  %vm556_vm9 = vcmp.eq.s32.totalorder (!%p262_p2), %v2082_v53, %v2060_v34  ;;  %vm555_vm10 = vcmp.le.s32.totalorder (!%p262_p2), %v2082_v53, %v2057_v33  ;;  %s1924_s17 = smov (!%p262_p2), 88   ;;  %s1925_s18 = smov (!%p262_p2), 112  }
   0xc   : > { %1848 = vmatpush3.bf16.msra.mxu0 (!%p262_p2), %v1847_v14  ;;  %s1926_s19 = smov (!%p262_p2), 56   ;;  %s1927_s20 = smov (!%p262_p2), 80  }
   0xd   : > { %s2271_s28 = smov (!%p293_p3, %s1692_s28), 1  ;;  %1792 = vmatprep.subr.mxu0 %v1914_v13  ;;  %v521_v36 = vand.u32 1, %v427_v35  ;;  %v533_v44 = vshra.s32 %v427_v35, 1  ;;  %v546_v50 = vshra.s32 %v427_v35, 2  ;;  %s1928_s21 = smov 104  }
   0xe   : > { %s1697_s29 = sshll.u32 %s2271_s28, 3  ;;  %s1929_s22 = smov 48  }
   0xf   : > { %s296_s10 = scalar_lea.vmem %s2259_s0, %s1697_s29  ;;  %vm2063_vm4 = vcmp.eq.s32.totalorder %v521_v36, 1  ;;  %v2072_v45 = vand.u32 1, %v533_v44  ;;  %v2080_v51 = vand.u32 1, %v546_v50  ;;  %s1930_s23 = smov 72  }
  0x10   : > { %v1996_v0 = vld [vmem:[%s296_s10] sm:$0xff]  ;;  %s1917_s10 = smov 121   ;;  %s1931_s24 = smov 40  }
  0x11   : > { %v305_v1 = vsel %vm304_vm0, %v1996_v0, 0.0  ;;  %vm535_vm6 = vcmp.eq.s32.totalorder %v2072_v45, 1  ;;  %vm548_vm8 = vcmp.eq.s32.totalorder %v2080_v51, 1  ;;  %s1932_s25 = smov 16   ;;  %s1933_s26 = smov 8  }
  0x12   : > { %306 = vadd.xlane.f32.xlu0 %v305_v1 }
  0x9f   : > { %v307_v2 = vpop.xlane.xlu0 %306 }
  0xa0   : > { %v309_v3 = vmul.f32 0.03125, %v307_v2 }
  0xa2   : > { %v310_v4 = vsub.f32 %v1996_v0, %v309_v3 }
  0xa4   : > { %v311_v5 = vmul.f32 %v310_v4, %v310_v4 }
  0xa6   : > { %v312_v6 = vsel %vm304_vm0, %v311_v5, 0.0 }
  0xa7   : > { %313 = vadd.xlane.f32.xlu0 %v312_v6 }
 0x134   : > { %v314_v15 = vpop.xlane.xlu0 %313 }
 0x135   : > { %v315_v16 = vmul.f32 0.03125, %v314_v15 }
 0x137   : > { %v316_v17 = vadd.f32 1e-12, %v315_v16 }
 0x139   : > { %1886 = vrsqrt.f32 %v316_v17 }
 0x143   : > { %v1887_v18 = vpop.eup %1886 }
 0x144   : > { %v318_v20 = vmul.f32 %v1887_v18, %v310_v4 }
 0x146   : > { %v325_v22 = vmul.f32 %v1699_v19, %v318_v20 }
 0x148   : > { %v332_v23 = vadd.f32 %v1700_v21, %v325_v22 }
 0x14a   : > { %1770 = vmatmul.mubr.msk.f32.vlgmr.msra.gmra.mrb[0].mxu0 %vm304_vm0, %v332_v23 }
 0x14b   : > { %1794 = vmatprep.mubr.msk.f32.mxu0 %vm1913_vm1, %v1914_v13 }
 0x21d   : > { %v413_v26 = vpop.f32.mrb[0].mxu0 }
 0x21e   : > { %v2042_v27 = vadd.f32 %v1701_v25, %v413_v26  ;;  %v1771_v28 = vpop.f32.mrb[1].mxu0 }
 0x220   : > { %559 = vrot.lane.b32.xlu1 %v2042_v27, %s1915_s30  ;;  %1775 = vmatmul.mubr.msk.f32.vlgmr.msra.gmra.mrb[0].mxu1 %vm435_vm2, %v2042_v27 }
 0x221   : > { %1779 = vmatprep.mubr.msk.f32.mxu1 %vm1913_vm1, %v1914_v13 }
 0x292   : > { %v560_v29 = vpop.permute.xlu1 %559 }
 0x293   : > { %1778 = vmatpush3.xpose.msk.msra.mxu1 %vm435_vm2, %v560_v29 }
 0x294   : > { %1782 = vmatprep.subr.mxu1 %v1914_v13 }
 0x296   : > { %1780 = vmatmul.mubr.msk.f32.vlgmr.msra.gmra.mrb[2].mxu1 %vm435_vm2, %v2042_v27 }
 0x297   : > { %1784 = vmatprep.mubr.msk.f32.mxu1 %vm1913_vm1, %v1914_v13 }
 0x2f3   : > { %v508_v30 = vpop.f32.mrb[0].mxu1 }
 0x2f4   : > { %516 = vrot.lane.b32.xlu0 %v508_v30, %s1916_s9  ;;  %513 = vrot.lane.b32.xlu1 %v508_v30, %s1917_s10  ;;  %v1776_v31 = vpop.f32.mrb[1].mxu1 }
 0x366   : > { %v517_v38 = vpop.permute.xlu0 %516  ;;  %v514_v39 = vpop.permute.xlu1 %513 }
 0x367   : > { %v520_v40 = vsel %vm519_vm3, %v514_v39, %v517_v38 }
 0x368   : > { %v523_v41 = vsel %vm2063_vm4, %v520_v40, %v508_v30 }
 0x369   : > { %525 = vrot.lane.b32.xlu1 %v523_v41, %s1918_s11  ;;  %v629_v42 = vpop.f32.mrb[2].mxu1 }
 0x36a   : > { %v1781_v43 = vpop.f32.mrb[3].mxu1 }
 0x36d   : > { %528 = vrot.lane.b32.xlu1 %v523_v41, %s1919_s12 }
 0x3db   : > { %v526_v46 = vpop.permute.xlu1 %525 }
 0x3df   : > { %v529_v47 = vpop.permute.xlu1 %528 }
 0x3e0   : > { %v532_v48 = vsel %vm531_vm5, %v526_v46, %v529_v47 }
 0x3e1   : > { %v536_v49 = vsel %vm535_vm6, %v532_v48, %v523_v41 }
 0x3e2   : > { %538 = vrot.lane.b32.xlu1 %v536_v49, %s1920_s13 }
 0x3e6   : > { %541 = vrot.lane.b32.xlu1 %v536_v49, %s1921_s14 }
 0x454   : > { %v539_v52 = vpop.permute.xlu1 %538 }
 0x458   : > { %v542_v54 = vpop.permute.xlu1 %541 }
 0x459   : > { %v545_v55 = vsel %vm544_vm7, %v539_v52, %v542_v54 }
 0x45a   : > { %v549_v56 = vsel %vm548_vm8, %v545_v55, %v536_v49 }
 0x45b   : > { %v551_v57 = vrot.slane %v549_v56, 1 }
 0x45d   : > { %v557_v58 = vsel %vm556_vm9, 0.0, %v551_v57 }
 0x45e   : > { %v558_v59 = vsel %vm555_vm10, %v549_v56, %v557_v58 }
 0x45f   : > { %v630_v60 = vadd.f32 %v629_v42, %v558_v59 }
 0x461   : > { %v633_v61 = vsel %vm435_vm2, %v630_v60, -inf }
 0x462   : > { %634 = vmax.xlane.f32.xlu1 %v633_v61 }
 0x473   : > { %644 = vrot.lane.b32.xlu1 %v2042_v27, %s1922_s15 }
 0x477   : > { %720 = vrot.lane.b32.xlu1 %v2042_v27, %s1923_s16 }
 0x47b   : > { %831 = vrot.lane.b32.xlu1 %v2042_v27, %s1924_s17 }
 0x4ef   : > { %v635_v62 = vpop.xlane.xlu1 %634 }
 0x4f0   : > { %v636_v63 = vsub.f32 %v630_v60, %v635_v62 }
 0x4f2   : > { %v637_v1 = vmul.f32 1.442695, %v636_v63 }
 0x4f3   : > { %v645_v2 = vpop.permute.xlu1 %644 }
 0x4f4   : > { %1888 = vpow2.f32 %v637_v1  ;;  %1783 = vmatpush3.msra.mxu1 %v645_v2 }
 0x4f5   : > { %1787 = vmatprep.subr.mxu1 %v1914_v13 }
 0x4f7   : > { %v721_v3 = vpop.permute.xlu1 %720 }
 0x4fb   : > { %v832_v4 = vpop.permute.xlu1 %831 }
 0x4fc   : > { %1793 = vmatpush3.xpose.msk.msra.mxu0 %vm435_vm2, %v832_v4 }
 0x4fd   : > { %1802 = vmatprep.subr.mxu0 %v1914_v13 }
 0x4fe   : > { %v1889_v5 = vpop.eup %1888 }
 0x4ff   : > { %1795 = vmatmul.mubr.msk.f32.vlgmr.msra.gmra.mrb[2].mxu0 %vm435_vm2, %v721_v3  ;;  %v639_v6 = vsel %vm435_vm2, %v1889_v5, 0.0 }
 0x500   : > { %640 = vadd.xlane.f32.xlu0 %v639_v6  ;;  %1804 = vmatprep.mubr.msk.f32.mxu0 %vm1913_vm1, %v1914_v13 }
 0x516   : > { %722 = vrot.lane.b32.xlu0 %v2034_v24, %s1923_s16  ;;  %s1934_s16 = smov 24  }
 0x58d   : > { %v641_v7 = vpop.xlane.xlu0 %640 }
 0x58e   : > { %1890 = vrcp.f32 %v641_v7 }
 0x591   : > { %v723_v11 = vpop.permute.xlu0 %722 }
 0x598   : > { %v1891_v8 = vpop.eup %1890 }
 0x599   : > { %v643_v9 = vmul.f32 %v1891_v8, %v1889_v5 }
 0x59b   : > { %1785 = vmatmul.mubr.msk.f32.vlgmr.msra.gmra.mrb[4].mxu1 %vm435_vm2, %v643_v9 }
 0x59c   : > { %1788 = vmatpush3.xpose.msk.msra.mxu1 %vm435_vm2, %v723_v11  ;;  %1789 = vmatprep.mubr.msk.f32.mxu1 %vm1913_vm1, %v1914_v13 }
 0x59d   : > { %1797 = vmatprep.subr.mxu1 %v1914_v13 }
 0x59f   : > { %1790 = vmatmul.mubr.msk.f32.vlgmr.msra.gmra.mrb[6].mxu1 %vm435_vm2, %v721_v3 }
 0x5a0   : > { %1799 = vmatprep.mubr.msk.f32.mxu1 %vm1913_vm1, %v1914_v13 }
 0x5d2   : > { %v901_v12 = vpop.f32.mrb[2].mxu0 }
 0x5d3   : > { %v1796_v14 = vpop.f32.mrb[3].mxu0 }
 0x66e   : > { %v2118_v15 = vpop.f32.mrb[4].mxu1 }
 0x66f   : > { %v1786_v16 = vpop.f32.mrb[5].mxu1 }
 0x672   : > { %v794_v17 = vpop.f32.mrb[6].mxu1 }
 0x673   : > { %802 = vrot.lane.b32.xlu1 %v794_v17, %s1916_s9  ;;  %799 = vrot.lane.b32.xlu0 %v794_v17, %s1917_s10  ;;  %v1791_v18 = vpop.f32.mrb[7].mxu1 }
 0x6e5   : > { %v803_v19 = vpop.permute.xlu1 %802  ;;  %v800_v20 = vpop.permute.xlu0 %799 }
 0x6e6   : > { %v805_v21 = vsel %vm519_vm3, %v800_v20, %v803_v19 }
 0x6e7   : > { %v806_v22 = vsel %vm2063_vm4, %v805_v21, %v794_v17 }
 0x6e8   : > { %811 = vrot.lane.b32.xlu1 %v806_v22, %s1919_s12  ;;  %808 = vrot.lane.b32.xlu0 %v806_v22, %s1918_s11 }
 0x6ec   : > { %994 = vrot.lane.b32.xlu0 %v2034_v24, %s1925_s18 }
 0x75a   : > { %v812_v23 = vpop.permute.xlu1 %811  ;;  %v809_v25 = vpop.permute.xlu0 %808 }
 0x75b   : > { %v814_v26 = vsel %vm531_vm5, %v809_v25, %v812_v23 }
 0x75c   : > { %v815_v28 = vsel %vm535_vm6, %v814_v26, %v806_v22 }
 0x75d   : > { %820 = vrot.lane.b32.xlu0 %v815_v28, %s1921_s14  ;;  %817 = vrot.lane.b32.xlu1 %v815_v28, %s1920_s13 }
 0x75e   : > { %v995_v29 = vpop.permute.xlu0 %994 }
 0x75f   : > { %1803 = vmatpush3.xpose.msk.msra.mxu0 %vm435_vm2, %v995_v29 }
 0x760   : > { %1812 = vmatprep.subr.mxu0 %v1914_v13 }
 0x761   : > { %992 = vrot.lane.b32.xlu1 %v2042_v27, %s1925_s18 }
 0x7cf   : > { %v818_v30 = vpop.permute.xlu1 %817  ;;  %v821_v31 = vpop.permute.xlu0 %820 }
 0x7d0   : > { %v823_v32 = vsel %vm544_vm7, %v818_v30, %v821_v31 }
 0x7d1   : > { %v824_v35 = vsel %vm548_vm8, %v823_v32, %v815_v28 }
 0x7d2   : > { %v826_v36 = vrot.slane %v824_v35, 1 }
 0x7d3   : > { %v993_v38 = vpop.permute.xlu1 %992 }
 0x7d4   : > { %1805 = vmatmul.mubr.msk.f32.vlgmr.msra.gmra.mrb[4].mxu0 %vm435_vm2, %v993_v38  ;;  %v829_v39 = vsel %vm556_vm9, 0.0, %v826_v36 }
 0x7d5   : > { %v830_v40 = vsel %vm555_vm10, %v824_v35, %v829_v39  ;;  %1814 = vmatprep.mubr.msk.f32.mxu0 %vm1913_vm1, %v1914_v13 }
 0x7d6   : > { %v902_v41 = vadd.f32 %v901_v12, %v830_v40 }
 0x7d8   : > { %v905_v42 = vsel %vm435_vm2, %v902_v41, -inf }
 0x7d9   : > { %906 = vmax.xlane.f32.xlu0 %v905_v42 }
 0x7ef   : > { %916 = vrot.lane.b32.xlu0 %v2042_v27, %s1926_s19 }
 0x866   : > { %v907_v43 = vpop.xlane.xlu0 %906 }
 0x867   : > { %v908_v44 = vsub.f32 %v902_v41, %v907_v43 }
 0x869   : > { %v909_v46 = vmul.f32 1.442695, %v908_v44 }
 0x86a   : > { %v917_v47 = vpop.permute.xlu0 %916 }
 0x86b   : > { %1892 = vpow2.f32 %v909_v46  ;;  %1798 = vmatpush3.msra.mxu1 %v917_v47 }
 0x86c   : > { %1807 = vmatprep.subr.mxu1 %v1914_v13 }
 0x875   : > { %v1893_v48 = vpop.eup %1892 }
 0x876   : > { %v911_v49 = vsel %vm435_vm2, %v1893_v48, 0.0 }
 0x877   : > { %912 = vadd.xlane.f32.xlu1 %v911_v49 }
 0x888   : > { %1103 = vrot.lane.b32.xlu1 %v2042_v27, %s1927_s20 }
 0x8a7   : > { %v1066_v50 = vpop.f32.mrb[4].mxu0 }
 0x8a8   : > { %1074 = vrot.lane.b32.xlu1 %v1066_v50, %s1916_s9  ;;  %1071 = vrot.lane.b32.xlu0 %v1066_v50, %s1917_s10  ;;  %v1806_v52 = vpop.f32.mrb[5].mxu0 }
 0x904   : > { %v913_v54 = vpop.xlane.xlu1 %912 }
 0x905   : > { %1894 = vrcp.f32 %v913_v54 }
 0x908   : > { %v1104_v57 = vpop.permute.xlu1 %1103 }
 0x90f   : > { %v1895_v55 = vpop.eup %1894 }
 0x910   : > { %v915_v56 = vmul.f32 %v1895_v55, %v1893_v48 }
 0x912   : > { %1800 = vmatmul.mubr.msk.f32.vlgmr.msra.gmra.mrb[8].mxu1 %vm435_vm2, %v915_v56 }
 0x913   : > { %1808 = vmatpush3.xpose.msk.msra.mxu1 %vm435_vm2, %v1104_v57  ;;  %1809 = vmatprep.mubr.msk.f32.mxu1 %vm1913_vm1, %v1914_v13 }
 0x914   : > { %1817 = vmatprep.subr.mxu1 %v1914_v13 }
 0x916   : > { %1810 = vmatmul.mubr.msk.f32.vlgmr.msra.gmra.mrb[10].mxu1 %vm435_vm2, %v993_v38 }
 0x917   : > { %1819 = vmatprep.mubr.msk.f32.mxu1 %vm1913_vm1, %v1914_v13 }
 0x91a   : > { %v1075_v58 = vpop.permute.xlu1 %1074  ;;  %v1072_v59 = vpop.permute.xlu0 %1071 }
 0x91b   : > { %v1077_v60 = vsel %vm519_vm3, %v1072_v59, %v1075_v58 }
 0x91c   : > { %v1078_v61 = vsel %vm2063_vm4, %v1077_v60, %v1066_v50 }
 0x91d   : > { %1083 = vrot.lane.b32.xlu1 %v1078_v61, %s1919_s12  ;;  %1080 = vrot.lane.b32.xlu0 %v1078_v61, %s1918_s11 }
 0x921   : > { %1266 = vrot.lane.b32.xlu0 %v2034_v24, %s1928_s21 }
 0x98f   : > { %v1084_v62 = vpop.permute.xlu1 %1083  ;;  %v1081_v63 = vpop.permute.xlu0 %1080 }
 0x990   : > { %v1086_v1 = vsel %vm531_vm5, %v1081_v63, %v1084_v62  ;;  %v1554_v63 = vld [vmem:[%s2265_s6 + $0x8] sm:$0xff] }
 0x991   : > { %v1087_v2 = vsel %vm535_vm6, %v1086_v1, %v1078_v61  ;;  %v1555_v1 = vld [vmem:[%s2265_s6 + $0x10] sm:$0xff] }
 0x992   : > { %1092 = vrot.lane.b32.xlu0 %v1087_v2, %s1921_s14  ;;  %1089 = vrot.lane.b32.xlu1 %v1087_v2, %s1920_s13 }
 0x993   : > { %v1267_v3 = vpop.permute.xlu0 %1266 }
 0x994   : > { %1818 = vmatpush3.xpose.msk.msra.mxu1 %vm435_vm2, %v1267_v3  ;;  %v1556_v3 = vld [vmem:[%s2265_s6 + $0x18] sm:$0xff] }
 0x995   : > { %1827 = vmatprep.subr.mxu1 %v1914_v13 }
 0x996   : > { %1264 = vrot.lane.b32.xlu1 %v2042_v27, %s1928_s21  ;;  %s300_s21 = scalar_lea.vmem %s2267_s8, %s1697_s29 }
 0x9e5   : > { %v2177_v4 = vpop.f32.mrb[8].mxu1 }
 0x9e6   : > { %v1801_v24 = vpop.f32.mrb[9].mxu1 }
 0x9e9   : > { %v1173_v5 = vpop.f32.mrb[10].mxu1 }
 0x9ea   : > { %v1811_v6 = vpop.f32.mrb[11].mxu1 }
 0xa04   : > { %v1090_v7 = vpop.permute.xlu1 %1089  ;;  %v1093_v8 = vpop.permute.xlu0 %1092 }
 0xa05   : > { %v1095_v9 = vsel %vm544_vm7, %v1090_v7, %v1093_v8 }
 0xa06   : > { %v1096_v11 = vsel %vm548_vm8, %v1095_v9, %v1087_v2 }
 0xa07   : > { %v1098_v12 = vrot.slane %v1096_v11, 1 }
 0xa08   : > { %v1265_v14 = vpop.permute.xlu1 %1264 }
 0xa09   : > { %1820 = vmatmul.mubr.msk.f32.vlgmr.msra.gmra.mrb[12].mxu1 %vm435_vm2, %v1265_v14  ;;  %v1101_v16 = vsel %vm556_vm9, 0.0, %v1098_v12 }
 0xa0a   : > { %v1102_v17 = vsel %vm555_vm10, %v1096_v11, %v1101_v16  ;;  %1829 = vmatprep.mubr.msk.f32.mxu1 %vm1913_vm1, %v1914_v13 }
 0xa0b   : > { %v1174_v18 = vadd.f32 %v1173_v5, %v1102_v17 }
 0xa0d   : > { %v1177_v19 = vsel %vm435_vm2, %v1174_v18, -inf }
 0xa0e   : > { %1178 = vmax.xlane.f32.xlu0 %v1177_v19 }
 0xa24   : > { %1188 = vrot.lane.b32.xlu0 %v2042_v27, %s1929_s22 }
 0xa9b   : > { %v1179_v20 = vpop.xlane.xlu0 %1178 }
 0xa9c   : > { %v1180_v21 = vsub.f32 %v1174_v18, %v1179_v20 }
 0xa9e   : > { %v1181_v22 = vmul.f32 1.442695, %v1180_v21 }
 0xa9f   : > { %v1189_v23 = vpop.permute.xlu0 %1188 }
 0xaa0   : > { %1896 = vpow2.f32 %v1181_v22  ;;  %1813 = vmatpush3.msra.mxu0 %v1189_v23 }
 0xaa1   : > { %1822 = vmatprep.subr.mxu0 %v1914_v13 }
 0xaaa   : > { %v1897_v25 = vpop.eup %1896 }
 0xaab   : > { %v1183_v26 = vsel %vm435_vm2, %v1897_v25, 0.0 }
 0xaac   : > { %1184 = vadd.xlane.f32.xlu1 %v1183_v26 }
 0xabd   : > { %1375 = vrot.lane.b32.xlu1 %v2042_v27, %s1930_s23 }
 0xadc   : > { %v1338_v28 = vpop.f32.mrb[12].mxu1 }
 0xadd   : > { %v1821_v29 = vpop.f32.mrb[13].mxu1  ;;  %1343 = vrot.lane.b32.xlu0 %v1338_v28, %s1917_s10  ;;  %1346 = vrot.lane.b32.xlu1 %v1338_v28, %s1916_s9 }
 0xb39   : > { %v1185_v30 = vpop.xlane.xlu1 %1184 }
 0xb3a   : > { %1898 = vrcp.f32 %v1185_v30 }
 0xb3d   : > { %v1376_v35 = vpop.permute.xlu1 %1375 }
 0xb44   : > { %v1899_v31 = vpop.eup %1898 }
 0xb45   : > { %v1187_v32 = vmul.f32 %v1899_v31, %v1897_v25 }
 0xb47   : > { %1815 = vmatmul.mubr.msk.f32.vlgmr.msra.gmra.mrb[6].mxu0 %vm435_vm2, %v1187_v32 }
 0xb48   : > { %1823 = vmatpush3.xpose.msk.msra.mxu0 %vm435_vm2, %v1376_v35  ;;  %1824 = vmatprep.mubr.msk.f32.mxu0 %vm1913_vm1, %v1914_v13 }
 0xb49   : > { %1849 = vmatprep.subr.bf16.mxu0 %v1912_v10 }
 0xb4b   : > { %1825 = vmatmul.mubr.msk.f32.vlgmr.msra.gmra.mrb[8].mxu0 %vm435_vm2, %v1265_v14 }
 0xb4c   : > { %1840 = vmatprep.mubr.msk.f32.mxu0 %vm1913_vm1, %v1914_v13 }
 0xb4f   : > { %v1347_v36 = vpop.permute.xlu1 %1346  ;;  %v1344_v38 = vpop.permute.xlu0 %1343 }
 0xb50   : > { %v1349_v39 = vsel %vm519_vm3, %v1344_v38, %v1347_v36 }
 0xb51   : > { %v1350_v40 = vsel %vm2063_vm4, %v1349_v39, %v1338_v28 }
 0xb52   : > { %1355 = vrot.lane.b32.xlu1 %v1350_v40, %s1919_s12  ;;  %1352 = vrot.lane.b32.xlu0 %v1350_v40, %s1918_s11 }
 0xbc4   : > { %v1356_v41 = vpop.permute.xlu1 %1355  ;;  %v1353_v42 = vpop.permute.xlu0 %1352 }
 0xbc5   : > { %v1358_v43 = vsel %vm531_vm5, %v1353_v42, %v1356_v41 }
 0xbc6   : > { %v1359_v44 = vsel %vm535_vm6, %v1358_v43, %v1350_v40 }
 0xbc7   : > { %1364 = vrot.lane.b32.xlu1 %v1359_v44, %s1921_s14  ;;  %1361 = vrot.lane.b32.xlu0 %v1359_v44, %s1920_s13 }
 0xc1a   : > { %v1260_v13 = vpop.f32.mrb[6].mxu0 }
 0xc1b   : > { %v1816_v46 = vpop.f32.mrb[7].mxu0 }
 0xc1e   : > { %v1445_v47 = vpop.f32.mrb[8].mxu0 }
 0xc1f   : > { %v1826_v37 = vpop.f32.mrb[9].mxu0 }
 0xc39   : > { %v1365_v48 = vpop.permute.xlu1 %1364  ;;  %v1362_v49 = vpop.permute.xlu0 %1361 }
 0xc3a   : > { %v1367_v50 = vsel %vm544_vm7, %v1362_v49, %v1365_v48 }
 0xc3b   : > { %v1368_v52 = vsel %vm548_vm8, %v1367_v50, %v1359_v44 }
 0xc3c   : > { %v1370_v54 = vrot.slane %v1368_v52, 1 }
 0xc3e   : > { %v1373_v45 = vsel %vm556_vm9, 0.0, %v1370_v54 }
 0xc3f   : > { %v1374_v55 = vsel %vm555_vm10, %v1368_v52, %v1373_v45 }
 0xc40   : > { %v1446_v56 = vadd.f32 %v1445_v47, %v1374_v55 }
 0xc42   : > { %v1449_v57 = vsel %vm435_vm2, %v1446_v56, -inf }
 0xc43   : > { %1450 = vmax.xlane.f32.xlu0 %v1449_v57 }
 0xc59   : > { %1460 = vrot.lane.b32.xlu0 %v2042_v27, %s1931_s24  ;;  %v1553_v27 = vld [vmem:[%s2265_s6] sm:$0xff] }
 0xc5a   : > { %v1850_v2 = vpack.c.bf16 %v1554_v63, %v1553_v27 }
 0xc5c   : > { %1851 = vmatpush3.bf16.msra.mxu0 %v1850_v2 }
 0xc5d   : > { %1541 = vrot.lane.b32.xlu0 %v1260_v13, %s1932_s25  ;;  %1852 = vmatprep.subr.bf16.mxu0 %v1912_v10  ;;  %v1723_v10 = vld [vmem:[%s2266_s7] ss:$0 sm:$0xff] }
 0xcd0   : > { %v1451_v51 = vpop.xlane.xlu0 %1450 }
 0xcd1   : > { %v1452_v58 = vsub.f32 %v1446_v56, %v1451_v51 }
 0xcd3   : > { %v1453_v59 = vmul.f32 1.442695, %v1452_v58 }
 0xcd4   : > { %v1461_v60 = vpop.permute.xlu0 %1460 }
 0xcd5   : > { %1900 = vpow2.f32 %v1453_v59  ;;  %1828 = vmatpush3.msra.mxu1 %v1461_v60 }
 0xcd8   : > { %v1542_v8 = vpop.permute.xlu0 %1541 }
 0xcdf   : > { %v1901_v34 = vpop.eup %1900 }
 0xce0   : > { %v1455_v61 = vsel %vm435_vm2, %v1901_v34, 0.0 }
 0xce1   : > { %1456 = vadd.xlane.f32.xlu1 %v1455_v61 }
 0xcf2   : > { %1537 = vrot.lane.b32.xlu1 %v2177_v4, %s1933_s26  ;;  %v1853_v4 = vpack.c.bf16 %v1556_v3, %v1555_v1 }
 0xcf4   : > { %1854 = vmatpush3.bf16.msra.mxu0 %v1853_v4 }
 0xd6e   : > { %v1457_v33 = vpop.xlane.xlu1 %1456 }
 0xd6f   : > { %1902 = vrcp.f32 %v1457_v33 }
 0xd72   : > { %v1538_v6 = vpop.permute.xlu1 %1537 }
 0xd73   : > { %v1548_v7 = vsel %vm435_vm2, %v2118_v15, %v1538_v6 }
 0xd74   : > { %v1550_v11 = vsel %vm1549_vm11, %v1548_v7, %v1542_v8 }
 0xd79   : > { %v1903_v53 = vpop.eup %1902 }
 0xd7a   : > { %v1459_v62 = vmul.f32 %v1903_v53, %v1901_v34 }
 0xd7c   : > { %1830 = vmatmul.mubr.msk.f32.vlgmr.msra.gmra.mrb[14].mxu1 %vm435_vm2, %v1459_v62 }
 0xe4f   : > { %v1532_v24 = vpop.f32.mrb[14].mxu1 }
 0xe50   : > { %1545 = vrot.lane.b32.xlu1 %v1532_v24, %s1934_s16  ;;  %v1831_v5 = vpop.f32.mrb[15].mxu1 }
 0xec2   : > { %v1546_v9 = vpop.permute.xlu1 %1545 }
 0xec3   : > { %v1552_v12 = vsel %vm1551_vm12, %v1550_v11, %v1546_v9 }
 0xec4   : > { %1841 = vmatmul.mubr.msk.f32.vlgmr.msra.gmra.mrb[10].mxu0 %vm304_vm0, %v1552_v12 }
 0xf97   : > { %v1633_v14 = vpop.f32.mrb[10].mxu0 }
 0xf98   : > { %v1634_v16 = vadd.f32 %v1723_v10, %v1633_v14  ;;  %v1842_v17 = vpop.f32.mrb[11].mxu0 }
 0xf9a   : > { %v1637_v15 = vadd.f32 %v1634_v16, %v1996_v0 }
 0xf9c   : > { %1638 = vst.msk [vmem:[%s300_s21] sm:$0xff] %vm304_vm0, %v1637_v15 }
 0xf9d PF: > { %s18_s27 = sadd.s32 1, %s1910_s27  }
 0xf9e   : > { %p15_p4 = scmp.ge.s32.totalorder %s18_s27, 4  }
 0xfa0   :  { %17 = sbr.rel (!%p15_p4) target bundleno = 1 (0x1), region = 82 }

// kernel: conformer_block_forward.9
= control target key start
LH: loop header
LB: loop body
LE: loop exit
PB: predicated region body
PF: predicated region fallthrough
CT: control target
= control target key end

     0   :  { %vm37_vm0 = vcmask 261120   ;;  %s622_s0 = inlined_call_operand.vmem [shape: f32[16,32], index: 0, kind: input, shape index: {}]   ;;  %s623_s1 = inlined_call_operand.vmem [shape: f32[1,32], index: 1, kind: input, shape index: {}]   ;;  %s624_s2 = inlined_call_operand.vmem [shape: f32[1,32], index: 2, kind: input, shape index: {}]   ;;  %s625_s3 = inlined_call_operand.vmem [shape: f32[32,64], index: 3, kind: input, shape index: {}]   ;;  %s626_s4 = inlined_call_operand.vmem [shape: f32[1,64], index: 4, kind: input, shape index: {}]   ;;  %s627_s5 = inlined_call_operand.vmem [shape: f32[64,32], index: 5, kind: input, shape index: {}]   ;;  %s628_s6 = inlined_call_operand.vmem [shape: f32[1,32], index: 6, kind: input, shape index: {}]   ;;  %s629_s7 = inlined_call_operand.vmem [shape: f32[1,32], index: 7, kind: input, shape index: {}]   ;;  %s630_s8 = inlined_call_operand.vmem [shape: f32[1,32], index: 8, kind: input, shape index: {}]   ;;  %s631_s9 = inlined_call_operand.hbm [shape: f32[16,32], index: 9, kind: output, shape index: {}]  }
   0x1   :  { %v531_v0 = vld [vmem:[%s622_s0] sm:$0xff]  ;;  %v536_v1 = vld [vmem:[%s622_s0 + $0x8] sm:$0xff] }
   0x2   :  { %14 = vsyncpa [#allocation3], 0  ;;  %v38_v2 = vsel %vm37_vm0, %v531_v0, 0.0  ;;  %v41_v3 = vsel %vm37_vm0, %v536_v1, 0.0  ;;  %v81_v14 = vld [vmem:[%s625_s3] sm:$0xff]  ;;  %v82_v15 = vld [vmem:[%s625_s3 + $0x8] sm:$0xff] }
   0x3   :  { %39 = vadd.xlane.f32.xlu0 %v38_v2  ;;  %v83_v16 = vld [vmem:[%s625_s3 + $0x10] sm:$0xff]  ;;  %v408_v17 = vpack.c.bf16 %v82_v15, %v81_v14  ;;  %v84_v18 = vld [vmem:[%s625_s3 + $0x18] sm:$0xff]  ;;  %v350_v27 = vld [vmem:[%s623_s1] ss:$0 sm:$0xff]  ;;  %vm202_vm1 = vcmask 523264   ;;  %s475_s20 = smov [#allocation2]  }
   0x4   :  { %v412_v19 = vpack.c.bf16 %v84_v18, %v83_v16  ;;  %v351_v29 = vld [vmem:[%s624_s2] ss:$0 sm:$0xff]  ;;  %v188_v37 = vld [vmem:[%s627_s5 + $0x8] sm:$0xff]  ;;  %v189_v39 = vld [vmem:[%s627_s5 + $0x10] sm:$0xff]  ;;  %s339_s21 = sshll.u32 %s475_s20, 4  ;;  %s340_s21 = int_to_ptr.vmem [resolvable:$true] %s339_s21 }
   0x5   :  { %409 = vmatprep.subr.bf16.mxu0 %v408_v17  ;;  %v187_v36 = vld [vmem:[%s627_s5] sm:$0xff]  ;;  %v190_v40 = vld [vmem:[%s627_s5 + $0x18] sm:$0xff]  ;;  %v192_v43 = vld [vmem:[%s627_s5 + $0x28] sm:$0xff]  ;;  %s451_s3 = scalar_lea.vmem %s340_s21, 256  ;;  %p456_p1 = scmp.lt.s32.totalorder %s340_s21, %s340_s21 }
   0x6   :  { %411 = vmatpush3.bf16.msra.mxu0 %v408_v17  ;;  %v416_v38 = vpack.c.bf16 %v188_v37, %v187_v36  ;;  %v420_v41 = vpack.c.bf16 %v190_v40, %v189_v39  ;;  %v191_v42 = vld [vmem:[%s627_s5 + $0x20] sm:$0xff]  ;;  %v193_v45 = vld [vmem:[%s627_s5 + $0x30] sm:$0xff]  ;;  %v194_v46 = vld [vmem:[%s627_s5 + $0x38] sm:$0xff]  ;;  %p452_p0 = scmp.ne.s32.totalorder %s340_s21, %s451_s3  ;;  %p457_p2 = scmp.lt.s32.totalorder %s451_s3, %s451_s3 }
   0x7   :  { %42 = vadd.xlane.f32.xlu0 %v41_v3  ;;  %413 = vmatprep.subr.bf16.mxu0 %v412_v19  ;;  %v424_v44 = vpack.c.bf16 %v192_v43, %v191_v42  ;;  %v428_v47 = vpack.c.bf16 %v194_v46, %v193_v45  ;;  %v352_v48 = vld [vmem:[%s626_s4] ss:$0 sm:$0xff] }
   0x8   :  { %417 = vmatprep.subr.bf16.mxu1 %v416_v38  ;;  %v357_v63 = vld [vmem:[%s628_s6] ss:$0 sm:$0xff]  ;;  %p458_p3 = por %p457_p2, %p456_p1 }
   0x9   :  { %419 = vmatpush3.bf16.msra.mxu1 %v416_v38 }
   0xa   :  { %415 = vmatpush3.bf16.msra.mxu0 %v412_v19  ;;  %421 = vmatprep.subr.bf16.mxu1 %v420_v41  ;;  %p459_p4 = pnand %p458_p3, %p452_p0 }
   0xd   :  { %423 = vmatpush3.bf16.msra.mxu1 %v420_v41 }
   0xe   :  { %425 = vmatprep.subr.bf16.mxu1 %v424_v44 }
  0x11   :  { %427 = vmatpush3.bf16.msra.mxu1 %v424_v44 }
  0x12   :  { %429 = vmatprep.subr.bf16.mxu1 %v428_v47 }
  0x15   :  { %431 = vmatpush3.bf16.msra.mxu1 %v428_v47 }
  0x90   :  { %v40_v4 = vpop.xlane.xlu0 %39 }
  0x91   :  { %v45_v5 = vmul.f32 0.03125, %v40_v4 }
  0x93   :  { %v47_v6 = vsub.f32 %v531_v0, %v45_v5 }
  0x94   :  { %v43_v7 = vpop.xlane.xlu0 %42 }
  0x95   :  { %v46_v8 = vmul.f32 0.03125, %v43_v7  ;;  %v49_v9 = vmul.f32 %v47_v6, %v47_v6 }
  0x97   :  { %v48_v10 = vsub.f32 %v536_v1, %v46_v8  ;;  %v51_v11 = vsel %vm37_vm0, %v49_v9, 0.0 }
  0x98   :  { %52 = vadd.xlane.f32.xlu1 %v51_v11 }
  0x99   :  { %v50_v12 = vmul.f32 %v48_v10, %v48_v10 }
  0x9b   :  { %v54_v13 = vsel %vm37_vm0, %v50_v12, 0.0 }
  0x9c   :  { %55 = vadd.xlane.f32.xlu1 %v54_v13 }
 0x125   :  { %v53_v20 = vpop.xlane.xlu1 %52 }
 0x126   :  { %v57_v21 = vmul.f32 0.03125, %v53_v20 }
 0x128   :  { %v59_v22 = vadd.f32 1e-12, %v57_v21 }
 0x129   :  { %v56_v23 = vpop.xlane.xlu1 %55 }
 0x12a   :  { %435 = vrsqrt.f32 %v59_v22  ;;  %v58_v24 = vmul.f32 0.03125, %v56_v23 }
 0x12c   :  { %v60_v25 = vadd.f32 1e-12, %v58_v24 }
 0x12e   :  { %437 = vrsqrt.f32 %v60_v25 }
 0x134   :  { %v436_v26 = vpop.eup %435 }
 0x135   :  { %v63_v28 = vmul.f32 %v436_v26, %v47_v6 }
 0x137   :  { %v71_v30 = vmul.f32 %v350_v27, %v63_v28 }
 0x138   :  { %v438_v31 = vpop.eup %437 }
 0x139   :  { %v64_v32 = vmul.f32 %v438_v31, %v48_v10  ;;  %v79_v33 = vadd.f32 %v351_v29, %v71_v30  ;;  %v361_v31 = vld [vmem:[%s630_s8] ss:$0 sm:$0xff] }
 0x13b   :  { %v72_v34 = vmul.f32 %v350_v27, %v64_v32  ;;  %386 = vmatprep.mubr.msk.f32.mxu0 %vm37_vm0, %v79_v33  ;;  %v360_v27 = vld [vmem:[%s629_s7] ss:$0 sm:$0xff] }
 0x13d   :  { %v80_v35 = vadd.f32 %v351_v29, %v72_v34 }
 0x13f   :  { %387 = vmatmul.mubr.msk.f32.vlgmr.msra.gmra.mrb[0].mxu0 %vm37_vm0, %v80_v35 }
 0x212   :  { %v388_v49 = vpop.f32.mrb[0].mxu0 }
 0x213   :  { %v170_v50 = vadd.f32 %v388_v49, %v352_v48  ;;  %v164_v51 = vpop.f32.mrb[1].mxu0 }
 0x214   :  { %v165_v52 = vadd.f32 %v352_v48, %v164_v51 }
 0x215   :  { %v356_v53 = vmul.f32 -1.442695, %v170_v50 }
 0x216   :  { %v355_v54 = vmul.f32 -1.442695, %v165_v52 }
 0x217   :  { %439 = vpow2.f32 %v356_v53 }
 0x218   :  { %441 = vpow2.f32 %v355_v54 }
 0x221   :  { %v440_v55 = vpop.eup %439 }
 0x222   :  { %v442_v56 = vpop.eup %441  ;;  %v180_v57 = vadd.f32 1.0, %v440_v55 }
 0x223   :  { %v179_v58 = vadd.f32 1.0, %v442_v56 }
 0x224   :  { %443 = vrcp.f32 %v180_v57 }
 0x225   :  { %445 = vrcp.f32 %v179_v58 }
 0x22e   :  { %v444_v59 = vpop.eup %443 }
 0x22f   :  { %v446_v60 = vpop.eup %445  ;;  %v186_v62 = vmul.f32 %v444_v59, %v170_v50 }
 0x230   :  { %v185_v61 = vmul.f32 %v446_v60, %v165_v52 }
 0x232   :  { %405 = vmatprep.mubr.msk.f32.mxu1 %vm202_vm1, %v185_v61 }
 0x233   :  { %406 = vmatmul.mubr.msk.f32.vlgmr.msra.gmra.mrb[0].mxu1 %vm202_vm1, %v186_v62 }
 0x306   :  { %v407_v2 = vpop.f32.mrb[0].mxu1 }
 0x307   :  { %v281_v3 = vadd.f32 %v407_v2, %v357_v63  ;;  %v275_v4 = vpop.f32.mrb[1].mxu1 }
 0x308   :  { %v276_v5 = vadd.f32 %v357_v63, %v275_v4 }
 0x309   :  { %v285_v6 = vmul.f32 0.5, %v281_v3 }
 0x30a   :  { %v284_v7 = vmul.f32 0.5, %v276_v5 }
 0x30b   :  { %v287_v8 = vadd.f32 %v285_v6, %v536_v1 }
 0x30c   :  { %v286_v9 = vadd.f32 %v284_v7, %v531_v0 }
 0x30d   :  { %v293_v10 = vsel %vm37_vm0, %v287_v8, 0.0 }
 0x30e   :  { %294 = vadd.xlane.f32.xlu1 %v293_v10  ;;  %v290_v11 = vsel %vm37_vm0, %v286_v9, 0.0 }
 0x30f   :  { %291 = vadd.xlane.f32.xlu0 %v290_v11 }
 0x39b   :  { %v295_v12 = vpop.xlane.xlu1 %294 }
 0x39c   :  { %v297_v13 = vmul.f32 0.03125, %v295_v12  ;;  %v292_v14 = vpop.xlane.xlu0 %291 }
 0x39d   :  { %v296_v15 = vmul.f32 0.03125, %v292_v14 }
 0x39e   :  { %v299_v16 = vsub.f32 %v287_v8, %v297_v13 }
 0x39f   :  { %v298_v17 = vsub.f32 %v286_v9, %v296_v15 }
 0x3a0   :  { %v301_v18 = vmul.f32 %v299_v16, %v299_v16 }
 0x3a1   :  { %v300_v19 = vmul.f32 %v298_v17, %v298_v17 }
 0x3a2   :  { %v305_v20 = vsel %vm37_vm0, %v301_v18, 0.0 }
 0x3a3   :  { %306 = vadd.xlane.f32.xlu1 %v305_v20  ;;  %v302_v1 = vsel %vm37_vm0, %v300_v19, 0.0 }
 0x3a4   :  { %303 = vadd.xlane.f32.xlu0 %v302_v1 }
 0x430   :  { %v307_v0 = vpop.xlane.xlu1 %306 }
 0x431   :  { %v309_v21 = vmul.f32 0.03125, %v307_v0  ;;  %v304_v22 = vpop.xlane.xlu0 %303 }
 0x432   :  { %v308_v23 = vmul.f32 0.03125, %v304_v22 }
 0x433   :  { %v311_v24 = vadd.f32 1e-12, %v309_v21 }
 0x434   :  { %v310_v25 = vadd.f32 1e-12, %v308_v23 }
 0x435   :  { %447 = vrsqrt.f32 %v311_v24 }
 0x436   :  { %449 = vrsqrt.f32 %v310_v25 }
 0x43f   :  { %v448_v26 = vpop.eup %447 }
 0x440   :  { %v450_v28 = vpop.eup %449  ;;  %v315_v29 = vmul.f32 %v448_v26, %v299_v16 }
 0x441   :  { %v314_v30 = vmul.f32 %v450_v28, %v298_v17 }
 0x442   :  { %v323_v32 = vmul.f32 %v360_v27, %v315_v29 }
 0x443   :  { %v322_v33 = vmul.f32 %v360_v27, %v314_v30 }
 0x444   :  { %v331_v34 = vadd.f32 %v361_v31, %v323_v32 }
 0x445   :  { %v330_v35 = vadd.f32 %v361_v31, %v322_v33 }
 0x446   :  { %333 = vst.msk [vmem:[#allocation2 + $0x8] sm:$0xff] %vm37_vm0, %v331_v34 }
 0x447   :  { %332 = vst.msk [vmem:[#allocation2] sm:$0xff] %vm37_vm0, %v330_v35 }
 0x448   :  { %462 = shalt.err (!%p459_p4)
}
 0x449   :  { %s463_s22 = scalar_lea.hbm %s631_s9, 256 }
 0x44a   :  { %p464_p5 = scmp.ne.s32.totalorder %s631_s9, %s463_s22  ;;  %p467_p6 = scmp.lt.u32.totalorder %s463_s22, %s631_s9 }
 0x44c   :  { %p469_p7 = pnand %p467_p6, %p464_p5 }
 0x44e   :  { %472 = shalt.err (!%p469_p7)
}
 0x44f   :  { %s476_s2 = smov 128   ;;  %s477_s26 = smov 8  }
 0x450   :  { %345 = dma.vmem_to_hbm [thread:$0]  %s340_s21, 256, %s631_s9, [#allocation3], %s476_s2, %s476_s2, %s477_s26  }
 0x451   :  { %473 = dma.done.wait [#allocation3], 256  }
 0x452   :  { %474 = vsyncadd [#allocation3], 4294967040 }
 0x453   :  { %349 = vsyncpa [#allocation3], 1 }

</bundles_post_ra>
